<compile_context>
chip_gen: v7x
topology: tpu7x:2x2x1
jax: 0.10.0
libtpu: 0.0.40
codegen_flags: <defaults>
</compile_context>

<pallas_src>
import functools

import jax
import jax.numpy as jnp
from jax import lax
from jax.experimental import pallas as pl
from jax.experimental.pallas import tpu as pltpu


_TIME_CHUNK = 8  # timesteps per recurrent grid step (fully unrolled inside the kernel)


def _round_up(x, m):
    return ((x + m - 1) // m) * m


def _row_tile(n, max_tile=256):
    """Largest multiple of 8 that divides n, <= max_tile, with >=2 blocks when n>=16
    (keeps both TensorCores busy on v7x)."""
    cap = n if n < 16 else min(max_tile, n // 2)
    t = max(8, (cap // 8) * 8)
    while t > 8 and n % t:
        t -= 8
    return t if n % t == 0 else n


def _col_tile(n, max_tile=1024, align=128):
    """Largest multiple of `align` dividing n (n is pre-padded to a multiple of align)."""
    t = max(align, (min(max_tile, n) // align) * align)
    while t > align and n % t:
        t -= align
    return t


def _vmem_need(shapes, dtype_bytes=4, bufs=2):
    """Rough scoped-VMEM requirement for (lane-padded, double-buffered) blocks."""
    tot = 0
    for r, c in shapes:
        tot += bufs * _round_up(max(r, 1), 8) * _round_up(c, 128) * dtype_bytes
    return tot


def _mosaic(dims, vmem_bytes=None):
    if vmem_bytes is None:
        return pltpu.CompilerParams(dimension_semantics=dims)
    return pltpu.CompilerParams(dimension_semantics=dims,
                                vmem_limit_bytes=int(vmem_bytes))


# ----------------------------- Pallas kernels ------------------------------


def matmul_bias_kernel(x_ref, w_ref, b_ref, out_ref):
    """out = x @ w + b on one row tile (full K / full N)."""
    out_ref[...] = (jnp.dot(x_ref[...], w_ref[...],
                            preferred_element_type=jnp.float32)
                    + b_ref[...]).astype(out_ref.dtype)


def gru_chunk_kernel(gx_ref, mask_ref, whh_ref, bhn_ref, out_ref, h_sc,
                     *, chunk, bsz, hidden):
    """GRU recurrence over one time-chunk (grid axis = time chunks, "arbitrary").

    gx_ref  : (chunk*bsz, 3H)  precomputed x @ W_ih + bias (gate columns [r | z | n])
    mask_ref: (chunk*bsz, 1)   float 1.0 where t < lens[b]
    whh_ref : (H, 3H)          columns [W_hr | W_hz | W_hn]
    bhn_ref : (1, H)           b_hn (kept separate for the r * (...) term)
    out_ref : (chunk*bsz, H)   zeros for t >= lens[b]
    h_sc    : (bsz, H) VMEM scratch -- hidden state carried across chunks
    """
    H = hidden

    @pl.when(pl.program_id(0) == 0)
    def _():
        h_sc[...] = jnp.zeros_like(h_sc)

    # Loop-invariant loads hoisted off the recurrence.
    whh = whh_ref[...]
    b_hn = bhn_ref[...]

    def step(t, h_prev):
        row = pl.multiple_of(t * bsz, bsz)
        gx = gx_ref[pl.ds(row, bsz), :]                      # (bsz, 3H)
        gh = jnp.dot(h_prev, whh,
                     preferred_element_type=jnp.float32)     # (bsz, 3H)
        r = jax.nn.sigmoid(gx[:, :H] + gh[:, :H])
        z = jax.nn.sigmoid(gx[:, H:2 * H] + gh[:, H:2 * H])
        n = jnp.tanh(gx[:, 2 * H:] + r * (gh[:, 2 * H:] + b_hn))
        h_new = (1.0 - z) * n + z * h_prev
        m = mask_ref[pl.ds(row, bsz), :]                     # (bsz, 1), {0,1}
        # pad_packed_sequence: padded outputs are zero (m*h_new == m*h_upd for m in {0,1}).
        out_ref[pl.ds(row, bsz), :] = (m * h_new).astype(out_ref.dtype)
        # pack_padded_sequence: freeze state past lens[b].
        return h_prev + m * (h_new - h_prev)

    # Hidden state lives in the fori_loop carry (vregs) inside the chunk; the
    # scratch is only touched once per chunk to carry h across grid steps.
    h_final = lax.fori_loop(0, chunk, step, h_sc[...], unroll=True)
    h_sc[...] = h_final


def enc_sample_proj_kernel(x_ref, eps_ref, w1_ref, b1_ref, w2_ref, b2_ref,
                           wz_ref, bz_ref, enc_ref, gxz_ref, *, latent):
    """Encoder (Linear->tanh->Linear, fused mu|log_sigma) + reparameterised sample
    + latent-GRU input projection, all on one row tile."""
    L = latent
    h = jnp.tanh(jnp.dot(x_ref[...], w1_ref[...],
                         preferred_element_type=jnp.float32) + b1_ref[...])
    enc = jnp.dot(h, w2_ref[...],
                  preferred_element_type=jnp.float32) + b2_ref[...]   # (tm, 2L)
    enc_ref[...] = enc.astype(enc_ref.dtype)
    z = enc[:, :L] + jnp.exp(enc[:, L:]) * eps_ref[...]               # (tm, L)
    gxz_ref[...] = (jnp.dot(z, wz_ref[...],
                            preferred_element_type=jnp.float32)
                    + bz_ref[...]).astype(gxz_ref.dtype)


def dec_kernel(x_ref, w1_ref, b1_ref, w2_ref, b2_ref, out_ref, h_sc):
    """Decoder Linear->tanh->Linear on one (row-tile, vocab-tile) block.

    The tanh hidden is computed once per row tile (vocab tile j == 0) and cached
    in VMEM scratch; the vocab matmul runs in bf16 with f32 accumulation.
    """
    @pl.when(pl.program_id(1) == 0)
    def _():
        h_sc[...] = jnp.tanh(
            jnp.dot(x_ref[...], w1_ref[...],
                    preferred_element_type=jnp.float32) + b1_ref[...]
        ).astype(h_sc.dtype)
    out_ref[...] = (jnp.dot(h_sc[...], w2_ref[...],
                            preferred_element_type=jnp.float32)
                    + b2_ref[...]).astype(out_ref.dtype)


# ------------------------------ wrappers ------------------------------------


def linear_rows(x, w, b, *, max_tile=256):
    """Row-tiled, pipelined  x @ w + b  (used for the GRU input projections)."""
    n, k = x.shape
    d = w.shape[-1]
    tm = _row_tile(n, max_tile)
    return pl.pallas_call(
        matmul_bias_kernel,
        out_shape=jax.ShapeDtypeStruct((n, d), jnp.float32),
        grid=(n // tm,),
        in_specs=[pl.BlockSpec((tm, k), lambda i: (i, 0)),
                  pl.BlockSpec((k, d), lambda i: (0, 0)),
                  pl.BlockSpec((1, d), lambda i: (0, 0))],
        out_specs=pl.BlockSpec((tm, d), lambda i: (i, 0)),
        compiler_params=_mosaic(("parallel",)),
    )(x, w, b)


def gru_recurrent(gx_flat, mask_flat, p, *, seqlen, bsz, chunk):
    """Time-chunked GRU recurrence: gx (N, 3H) time-major -> (N, H) time-major."""
    hidden = p['w_hh'].shape[0]
    n_chunks = seqlen // chunk
    rows = chunk * bsz
    kern = functools.partial(gru_chunk_kernel, chunk=chunk, bsz=bsz,
                             hidden=hidden)
    need = _vmem_need([(rows, 3 * hidden), (rows, 1), (rows, hidden),
                       (hidden, 3 * hidden), (1, hidden), (bsz, hidden)]) + (4 << 20)
    # Explicit scoped-VMEM limit: above v5e's 16 MiB default, sized from the actual
    # streamed blocks so v7x (64 MiB physical) is not over-allocated.
    vmem_bytes = min(max(need, 32 << 20), 100 << 20)
    return pl.pallas_call(
        kern,
        out_shape=jax.ShapeDtypeStruct((seqlen * bsz, hidden), jnp.float32),
        grid=(n_chunks,),
        in_specs=[pl.BlockSpec((rows, 3 * hidden), lambda c: (c, 0)),
                  pl.BlockSpec((rows, 1), lambda c: (c, 0)),
                  pl.BlockSpec((hidden, 3 * hidden), lambda c: (0, 0)),
                  pl.BlockSpec((1, hidden), lambda c: (0, 0))],
        out_specs=pl.BlockSpec((rows, hidden), lambda c: (c, 0)),
        scratch_shapes=[pltpu.VMEM((bsz, hidden), jnp.float32)],
        compiler_params=_mosaic(("arbitrary",), vmem_bytes=vmem_bytes),
    )(gx_flat, mask_flat, p['w_hh'], p['b_hn'])


def enc_sample_proj_forward(rnn_flat, eps_flat, p, *, latent):
    """Fused encoder + sample + latent-GRU input projection.

    Returns: enc_out (N, 2L) = [mu | log_sigma], gx_z (N, 3*Hz_padded).
    """
    n, hp1 = rnn_flat.shape
    hh = p['enc_w1'].shape[-1]
    l2 = p['enc_w2'].shape[-1]            # 2L
    g3 = p['gru_z']['w_ih'].shape[-1]     # 3 * padded latent hidden
    tm = _row_tile(n, 256)
    kern = functools.partial(enc_sample_proj_kernel, latent=latent)
    return pl.pallas_call(
        kern,
        out_shape=(jax.ShapeDtypeStruct((n, l2), jnp.float32),
                   jax.ShapeDtypeStruct((n, g3), jnp.float32)),
        grid=(n // tm,),
        in_specs=[pl.BlockSpec((tm, hp1), lambda i: (i, 0)),
                  pl.BlockSpec((tm, latent), lambda i: (i, 0)),
                  pl.BlockSpec((hp1, hh), lambda i: (0, 0)),
                  pl.BlockSpec((1, hh), lambda i: (0, 0)),
                  pl.BlockSpec((hh, l2), lambda i: (0, 0)),
                  pl.BlockSpec((1, l2), lambda i: (0, 0)),
                  pl.BlockSpec((latent, g3), lambda i: (0, 0)),
                  pl.BlockSpec((1, g3), lambda i: (0, 0))],
        out_specs=(pl.BlockSpec((tm, l2), lambda i: (i, 0)),
                   pl.BlockSpec((tm, g3), lambda i: (i, 0))),
        compiler_params=_mosaic(("parallel",)),
    )(rnn_flat, eps_flat, p['enc_w1'], p['enc_b1'], p['enc_w2'], p['enc_b2'],
      p['gru_z']['w_ih'], p['gru_z']['bias_x'])


def decoder_forward(x_flat, p):
    """Decoder MLP tiled over (rows parallel, padded-vocab arbitrary)."""
    n, lr = x_flat.shape
    hh = p['dec_w1'].shape[-1]
    vp = p['dec_w2'].shape[-1]            # vocab padded to a multiple of 128
    tm = _row_tile(n, 256)
    tn = _col_tile(vp, 1024)
    need = (_vmem_need([(tm, lr), (lr, hh), (1, hh), (tm, tn), (1, tn)])
            + _vmem_need([(hh, tn), (tm, hh)], dtype_bytes=2)) + (4 << 20)
    vmem_bytes = min(max(need, 32 << 20), 100 << 20)
    # Note: on v5e, if the bf16 w2 stream shows exposed DMA, a smaller tn with
    # pipeline_mode=pl.Buffered(3) on the w2 spec is the next lever.
    return pl.pallas_call(
        dec_kernel,
        out_shape=jax.ShapeDtypeStruct((n, vp), jnp.float32),
        grid=(n // tm, vp // tn),
        in_specs=[pl.BlockSpec((tm, lr), lambda i, j: (i, 0)),
                  pl.BlockSpec((lr, hh), lambda i, j: (0, 0)),
                  pl.BlockSpec((1, hh), lambda i, j: (0, 0)),
                  pl.BlockSpec((hh, tn), lambda i, j: (0, j)),
                  pl.BlockSpec((1, tn), lambda i, j: (0, j))],
        out_specs=pl.BlockSpec((tm, tn), lambda i, j: (i, j)),
        scratch_shapes=[pltpu.VMEM((tm, hh), jnp.bfloat16)],
        compiler_params=_mosaic(("parallel", "arbitrary"), vmem_bytes=vmem_bytes),
    )(x_flat, p['dec_w1'], p['dec_b1'], p['dec_w2'], p['dec_b2'])


# ------------------------------ params ---------------------------------------


def init_params(key, hp):
    ks = list(jax.random.split(key, 8))

    E = hp['item_embed_size']
    R = hp['rnn_size']
    Hh = hp['hidden_size']
    L = hp['latent_size']
    Lr = hp['latent_size_rnn']
    V = hp['total_items']
    Rp = _round_up(R, 128)      # item-GRU hidden, padded to 128 lanes
    Lrp = _round_up(Lr, 128)    # latent-GRU hidden, padded to 128 lanes
    Vp = _round_up(V, 128)      # vocab, padded to 128 lanes

    def xavier(k, d_in, d_out):
        std = (2.0 / (d_in + d_out)) ** 0.5
        return std * jax.random.normal(k, (d_in, d_out), jnp.float32)

    def gru_params(k, d_in, d_hid, d_pad):
        """Gate-concatenated GRU params (PyTorch gate order r,z,n), each gate block
        zero-padded to d_pad lanes so in-kernel gate slices are tile-aligned."""
        k1, k2, k3, k4 = jax.random.split(k, 4)
        s = 1.0 / (d_hid ** 0.5)
        u = lambda kk, shape: jax.random.uniform(kk, shape, jnp.float32, -s, s)
        w_ih = u(k1, (d_in, 3 * d_hid))
        w_hh = u(k2, (d_hid, 3 * d_hid))
        b_ih = u(k3, (1, 3 * d_hid))
        b_hh = u(k4, (1, 3 * d_hid))

        def pad_gate_cols(w):
            blocks = [jnp.pad(w[:, g * d_hid:(g + 1) * d_hid],
                              ((0, 0), (0, d_pad - d_hid))) for g in range(3)]
            return jnp.concatenate(blocks, axis=-1)

        # pre-fold biases: r,z gates get (b_ih + b_hh); n keeps b_in here and
        # b_hn separately (used inside the r * (...) term).
        bias_rzn = jnp.concatenate(
            [b_ih[:, :2 * d_hid] + b_hh[:, :2 * d_hid], b_ih[:, 2 * d_hid:]],
            axis=-1)
        return dict(
            w_ih=pad_gate_cols(w_ih),                                   # (d_in, 3*d_pad)
            w_hh=jnp.pad(pad_gate_cols(w_hh),
                         ((0, d_pad - d_hid), (0, 0))),                 # (d_pad, 3*d_pad)
            bias_x=pad_gate_cols(bias_rzn),                             # (1, 3*d_pad)
            b_hn=jnp.pad(b_hh[:, 2 * d_hid:],
                         ((0, 0), (0, d_pad - d_hid))),                 # (1, d_pad)
        )

    params = dict(
        item_embed=0.1 * jax.random.normal(ks[0], (V + 1, E), jnp.float32),
        gru=gru_params(ks[1], E, R, Rp),
        gru_z=gru_params(ks[2], L, Lr, Lrp),
        # encoder: Linear(R->Hh) -> tanh -> Linear(Hh->2L)  ([mu | log_sigma] fused)
        enc_w1=jnp.pad(xavier(ks[3], R, Hh), ((0, Rp - R), (0, 0))),
        enc_b1=jnp.zeros((1, Hh), jnp.float32),
        enc_w2=xavier(ks[4], Hh, 2 * L),
        enc_b2=jnp.zeros((1, 2 * L), jnp.float32),
        # decoder: Linear(Lr->Hh) -> tanh -> Linear(Hh->V); rows of w1 zero-padded to
        # the padded latent hidden, w2 columns zero-padded to Vp and stored in bf16.
        dec_w1=jnp.pad(xavier(ks[5], Lr, Hh), ((0, Lrp - Lr), (0, 0))),
        dec_b1=jnp.zeros((1, Hh), jnp.float32),
        dec_w2=jnp.pad(xavier(ks[6], Hh, V),
                       ((0, 0), (0, Vp - V))).astype(jnp.bfloat16),
        dec_b2=jnp.zeros((1, Vp), jnp.float32),
    )
    return params


# ------------------------------ model ----------------------------------------


@functools.partial(jax.jit, static_argnames=('latent_size',))
def model_mld_forward(params, x, x_lens, eps, latent_size):
    """Mirrors ModelMLD.forward.

    x      : (bsz, seqlen) int32 item ids
    x_lens : (bsz,) int32 valid lengths
    eps    : (bsz*seqlen, latent_size) standard-normal noise (reparam trick)
    returns: dec_out (bsz, seqlen, total_items),
             z_mean (bsz*seqlen, latent_size),
             z_log_sigma (bsz*seqlen, latent_size)
    """
    bsz, seqlen = x.shape
    L = latent_size
    V = params['item_embed'].shape[0] - 1

    chunk = min(_TIME_CHUNK, seqlen)
    bsz_p = _round_up(bsz, 8)
    seqlen_p = _round_up(seqlen, chunk)
    n = seqlen_p * bsz_p

    x_p = jnp.pad(x, ((0, bsz_p - bsz), (0, seqlen_p - seqlen)))
    lens_p = jnp.pad(x_lens.astype(jnp.int32), (0, bsz_p - bsz))   # pad rows: len 0

    # Precomputed (t, b) length mask: keeps compare/cast off the serial recurrent
    # path; also zeroes padded batch rows and padded timesteps.
    mask = (jnp.arange(seqlen_p, dtype=jnp.int32)[:, None] < lens_p[None, :])
    mask_flat = mask.astype(jnp.float32).reshape(n, 1)

    # Embedding gather, directly in time-major flat order (row = t*bsz_p + b).
    emb = jnp.take(params['item_embed'], x_p.T.reshape(-1), axis=0)       # (n, E)

    # item GRU: pipelined input projection + time-chunked recurrence
    gx1 = linear_rows(emb, params['gru']['w_ih'], params['gru']['bias_x'])
    rnn_flat = gru_recurrent(gx1, mask_flat, params['gru'],
                             seqlen=seqlen_p, bsz=bsz_p, chunk=chunk)     # (n, Rp)

    # eps, reordered to the same time-major padded row order
    # TODO(synk): the reference draws this noise host-side via np.random.normal;
    # here it is a deterministic caller-supplied input instead.
    eps_tb = jnp.transpose(eps.reshape(bsz, seqlen, L), (1, 0, 2))
    eps_tb = jnp.pad(eps_tb, ((0, seqlen_p - seqlen), (0, bsz_p - bsz), (0, 0)))
    eps_flat = eps_tb.reshape(n, L)

    # fused encoder + reparameterised sample + latent-GRU input projection
    enc_flat, gx2 = enc_sample_proj_forward(rnn_flat, eps_flat, params, latent=L)

    # latent GRU recurrence (hidden padded to 128 lanes; padding stays exactly 0)
    z_rnn_flat = gru_recurrent(gx2, mask_flat, params['gru_z'],
                               seqlen=seqlen_p, bsz=bsz_p, chunk=chunk)   # (n, Lrp)

    # decoder MLP (rows parallel, bf16 vocab matmul, cached tanh hidden)
    dec_flat = decoder_forward(z_rnn_flat, params)                        # (n, Vp)

    # Single layout fix-up at the end: time-major padded -> batch-major real.
    def to_batch_major(flat):
        a = flat.reshape(seqlen_p, bsz_p, flat.shape[-1])[:seqlen, :bsz, :]
        return jnp.transpose(a, (1, 0, 2))

    dec_out = to_batch_major(dec_flat)[..., :V]                           # (bsz, seq, V)
    enc_out = to_batch_major(enc_flat)                                    # (bsz, seq, 2L)
    z_mean = enc_out[..., :L].reshape(bsz * seqlen, L)
    z_log_sigma = enc_out[..., L:].reshape(bsz * seqlen, L)
    return dec_out, z_mean, z_log_sigma


# ------------------------------ main ------------------------------------------

if __name__ == "__main__":
    hp = {
        'item_embed_size': 32,
        'rnn_size': 128,
        'hidden_size': 128,
        'latent_size': 64,
        'latent_size_rnn': 32,
        'total_items': 128,
    }

    bsz, seqlen = 2, 8

    key = jax.random.PRNGKey(0)
    k_params, k_x, k_eps = jax.random.split(key, 3)

    params = init_params(k_params, hp)

    x = jax.random.randint(k_x, (bsz, seqlen), 0, hp['total_items'] + 1,
                           dtype=jnp.int32)
    x_lens = jnp.array([seqlen, seqlen - 2], dtype=jnp.int32)   # sorted desc
    eps = jax.random.normal(k_eps, (bsz * seqlen, hp['latent_size']),
                            jnp.float32)

    dec_out, z_mean, z_log_sigma = model_mld_forward(
        params, x, x_lens, eps, hp['latent_size'])
    jax.block_until_ready((dec_out, z_mean, z_log_sigma))

    assert dec_out.shape == (bsz, seqlen, hp['total_items'])
    assert z_mean.shape == (bsz * seqlen, hp['latent_size'])
    assert z_log_sigma.shape == (bsz * seqlen, hp['latent_size'])
    assert jnp.all(jnp.isfinite(dec_out))
    assert jnp.all(jnp.isfinite(z_mean))
    assert jnp.all(jnp.isfinite(z_log_sigma))

    print("KERNEL_OK")
</pallas_src>

<mosaic_0001>
module attributes {stable_mosaic.version = 11 : i64} {
  func.func @enc_sample_proj_kernel(%arg0: i32, %arg1: memref<32x128xf32, #tpu.memory_space<vmem>>, %arg2: memref<32x64xf32, #tpu.memory_space<vmem>>, %arg3: memref<128x128xf32, #tpu.memory_space<vmem>>, %arg4: memref<1x128xf32, #tpu.memory_space<vmem>>, %arg5: memref<128x128xf32, #tpu.memory_space<vmem>>, %arg6: memref<1x128xf32, #tpu.memory_space<vmem>>, %arg7: memref<64x384xf32, #tpu.memory_space<vmem>>, %arg8: memref<1x384xf32, #tpu.memory_space<vmem>>, %arg9: memref<32x128xf32, #tpu.memory_space<vmem>>, %arg10: memref<32x384xf32, #tpu.memory_space<vmem>>) attributes {dimension_semantics = [#tpu.dimension_semantics<parallel>], iteration_bounds = array<i64: 2>, scalar_prefetch = 0 : i64, scratch_operands = 0 : i64, tpu.core_type = #tpu.core_type<tc>, window_params = [{transform_indices = @transform_0, window_bounds = array<i64: 32, 128>}, {transform_indices = @transform_1, window_bounds = array<i64: 32, 64>}, {pipeline_mode = #tpu.pipeline_mode<synchronous>, transform_indices = @transform_2, window_bounds = array<i64: 128, 128>}, {pipeline_mode = #tpu.pipeline_mode<synchronous>, transform_indices = @transform_3, window_bounds = array<i64: 1, 128>}, {pipeline_mode = #tpu.pipeline_mode<synchronous>, transform_indices = @transform_4, window_bounds = array<i64: 128, 128>}, {pipeline_mode = #tpu.pipeline_mode<synchronous>, transform_indices = @transform_5, window_bounds = array<i64: 1, 128>}, {pipeline_mode = #tpu.pipeline_mode<synchronous>, transform_indices = @transform_6, window_bounds = array<i64: 64, 384>}, {pipeline_mode = #tpu.pipeline_mode<synchronous>, transform_indices = @transform_7, window_bounds = array<i64: 1, 384>}, {transform_indices = @transform_8, window_bounds = array<i64: 32, 128>}, {transform_indices = @transform_9, window_bounds = array<i64: 32, 384>}]} {
    %c0 = arith.constant 0 : index
    %c0_0 = arith.constant 0 : index
    %0 = vector.load %arg1[%c0, %c0_0] : memref<32x128xf32, #tpu.memory_space<vmem>>, vector<32x128xf32>
    %c0_1 = arith.constant 0 : index
    %c0_2 = arith.constant 0 : index
    %1 = vector.load %arg3[%c0_1, %c0_2] : memref<128x128xf32, #tpu.memory_space<vmem>>, vector<128x128xf32>
    %cst = arith.constant dense<0.000000e+00> : vector<32x128xf32>
    %2 = tpu.matmul %0, %1, %cst {dimension_numbers = #tpu.dot_dimension_numbers<[1], [0], [0], [1], [0, 0, 1, 1], [], []>} : vector<32x128xf32>, vector<128x128xf32>, vector<32x128xf32> -> vector<32x128xf32>
    %c0_3 = arith.constant 0 : index
    %c0_4 = arith.constant 0 : index
    %3 = vector.load %arg4[%c0_3, %c0_4] : memref<1x128xf32, #tpu.memory_space<vmem>>, vector<1x128xf32>
    %4 = vector.broadcast %3 : vector<1x128xf32> to vector<32x128xf32>
    %5 = arith.addf %2, %4 : vector<32x128xf32>
    %6 = math.tanh %5 : vector<32x128xf32>
    %c0_5 = arith.constant 0 : index
    %c0_6 = arith.constant 0 : index
    %7 = vector.load %arg5[%c0_5, %c0_6] : memref<128x128xf32, #tpu.memory_space<vmem>>, vector<128x128xf32>
    %cst_7 = arith.constant dense<0.000000e+00> : vector<32x128xf32>
    %8 = tpu.matmul %6, %7, %cst_7 {dimension_numbers = #tpu.dot_dimension_numbers<[1], [0], [0], [1], [0, 0, 1, 1], [], []>} : vector<32x128xf32>, vector<128x128xf32>, vector<32x128xf32> -> vector<32x128xf32>
    %c0_8 = arith.constant 0 : index
    %c0_9 = arith.constant 0 : index
    %9 = vector.load %arg6[%c0_8, %c0_9] : memref<1x128xf32, #tpu.memory_space<vmem>>, vector<1x128xf32>
    %10 = vector.broadcast %9 : vector<1x128xf32> to vector<32x128xf32>
    %11 = arith.addf %8, %10 : vector<32x128xf32>
    %c0_10 = arith.constant 0 : index
    %c0_11 = arith.constant 0 : index
    %12 = vector.load %arg9[%c0_10, %c0_11] : memref<32x128xf32, #tpu.memory_space<vmem>>, vector<32x128xf32>
    tpu.vector_store %arg9[%c0_10, %c0_11], %11 {strides = array<i32>} : memref<32x128xf32, #tpu.memory_space<vmem>>, vector<32x128xf32>,
    %13 = vector.extract_strided_slice %11 {offsets = [0, 0], sizes = [32, 64], strides = [1, 1]} : vector<32x128xf32> to vector<32x64xf32>
    %14 = vector.extract_strided_slice %11 {offsets = [0, 64], sizes = [32, 64], strides = [1, 1]} : vector<32x128xf32> to vector<32x64xf32>
    %15 = math.exp %14 : vector<32x64xf32>
    %c0_12 = arith.constant 0 : index
    %c0_13 = arith.constant 0 : index
    %16 = vector.load %arg2[%c0_12, %c0_13] : memref<32x64xf32, #tpu.memory_space<vmem>>, vector<32x64xf32>
    %17 = arith.mulf %15, %16 : vector<32x64xf32>
    %18 = arith.addf %13, %17 : vector<32x64xf32>
    %c0_14 = arith.constant 0 : index
    %c0_15 = arith.constant 0 : index
    %19 = vector.load %arg7[%c0_14, %c0_15] : memref<64x384xf32, #tpu.memory_space<vmem>>, vector<64x384xf32>
    %cst_16 = arith.constant dense<0.000000e+00> : vector<32x384xf32>
    %20 = tpu.matmul %18, %19, %cst_16 {dimension_numbers = #tpu.dot_dimension_numbers<[1], [0], [0], [1], [0, 0, 1, 1], [], []>} : vector<32x64xf32>, vector<64x384xf32>, vector<32x384xf32> -> vector<32x384xf32>
    %c0_17 = arith.constant 0 : index
    %c0_18 = arith.constant 0 : index
    %21 = vector.load %arg8[%c0_17, %c0_18] : memref<1x384xf32, #tpu.memory_space<vmem>>, vector<1x384xf32>
    %22 = vector.broadcast %21 : vector<1x384xf32> to vector<32x384xf32>
    %23 = arith.addf %20, %22 : vector<32x384xf32>
    %c0_19 = arith.constant 0 : index
    %c0_20 = arith.constant 0 : index
    %24 = vector.load %arg10[%c0_19, %c0_20] : memref<32x384xf32, #tpu.memory_space<vmem>>, vector<32x384xf32>
    tpu.vector_store %arg10[%c0_19, %c0_20], %23 {strides = array<i32>} : memref<32x384xf32, #tpu.memory_space<vmem>>, vector<32x384xf32>,
    return
  }
  func.func @transform_0(%arg0: i32) -> (i32, i32) {
    %c0_i32 = arith.constant 0 : i32
    %c0_i32_0 = arith.constant 0 : i32
    return %arg0, %c0_i32 : i32, i32
  }
  func.func @transform_1(%arg0: i32) -> (i32, i32) {
    %c0_i32 = arith.constant 0 : i32
    %c0_i32_0 = arith.constant 0 : i32
    return %arg0, %c0_i32 : i32, i32
  }
  func.func @transform_2(%arg0: i32) -> (i32, i32) {
    %c0_i32 = arith.constant 0 : i32
    %c0_i32_0 = arith.constant 0 : i32
    %c0_i32_1 = arith.constant 0 : i32
    return %c0_i32, %c0_i32_0 : i32, i32
  }
  func.func @transform_3(%arg0: i32) -> (i32, i32) {
    %c0_i32 = arith.constant 0 : i32
    %c0_i32_0 = arith.constant 0 : i32
    %c0_i32_1 = arith.constant 0 : i32
    return %c0_i32, %c0_i32_0 : i32, i32
  }
  func.func @transform_4(%arg0: i32) -> (i32, i32) {
    %c0_i32 = arith.constant 0 : i32
    %c0_i32_0 = arith.constant 0 : i32
    %c0_i32_1 = arith.constant 0 : i32
    return %c0_i32, %c0_i32_0 : i32, i32
  }
  func.func @transform_5(%arg0: i32) -> (i32, i32) {
    %c0_i32 = arith.constant 0 : i32
    %c0_i32_0 = arith.constant 0 : i32
    %c0_i32_1 = arith.constant 0 : i32
    return %c0_i32, %c0_i32_0 : i32, i32
  }
  func.func @transform_6(%arg0: i32) -> (i32, i32) {
    %c0_i32 = arith.constant 0 : i32
    %c0_i32_0 = arith.constant 0 : i32
    %c0_i32_1 = arith.constant 0 : i32
    return %c0_i32, %c0_i32_0 : i32, i32
  }
  func.func @transform_7(%arg0: i32) -> (i32, i32) {
    %c0_i32 = arith.constant 0 : i32
    %c0_i32_0 = arith.constant 0 : i32
    %c0_i32_1 = arith.constant 0 : i32
    return %c0_i32, %c0_i32_0 : i32, i32
  }
  func.func @transform_8(%arg0: i32) -> (i32, i32) {
    %c0_i32 = arith.constant 0 : i32
    %c0_i32_0 = arith.constant 0 : i32
    return %arg0, %c0_i32 : i32, i32
  }
  func.func @transform_9(%arg0: i32) -> (i32, i32) {
    %c0_i32 = arith.constant 0 : i32
    %c0_i32_0 = arith.constant 0 : i32
    return %arg0, %c0_i32 : i32, i32
  }
}

module attributes {stable_mosaic.version = 11 : i64} {
  func.func @matmul_bias_kernel(%arg0: i32, %arg1: memref<32x32xf32, #tpu.memory_space<vmem>>, %arg2: memref<32x384xf32, #tpu.memory_space<vmem>>, %arg3: memref<1x384xf32, #tpu.memory_space<vmem>>, %arg4: memref<32x384xf32, #tpu.memory_space<vmem>>) attributes {dimension_semantics = [#tpu.dimension_semantics<parallel>], iteration_bounds = array<i64: 2>, scalar_prefetch = 0 : i64, scratch_operands = 0 : i64, tpu.core_type = #tpu.core_type<tc>, window_params = [{transform_indices = @transform_0, window_bounds = array<i64: 32, 32>}, {pipeline_mode = #tpu.pipeline_mode<synchronous>, transform_indices = @transform_1, window_bounds = array<i64: 32, 384>}, {pipeline_mode = #tpu.pipeline_mode<synchronous>, transform_indices = @transform_2, window_bounds = array<i64: 1, 384>}, {transform_indices = @transform_3, window_bounds = array<i64: 32, 384>}]} {
    %c0 = arith.constant 0 : index
    %c0_0 = arith.constant 0 : index
    %0 = vector.load %arg1[%c0, %c0_0] : memref<32x32xf32, #tpu.memory_space<vmem>>, vector<32x32xf32>
    %c0_1 = arith.constant 0 : index
    %c0_2 = arith.constant 0 : index
    %1 = vector.load %arg2[%c0_1, %c0_2] : memref<32x384xf32, #tpu.memory_space<vmem>>, vector<32x384xf32>
    %cst = arith.constant dense<0.000000e+00> : vector<32x384xf32>
    %2 = tpu.matmul %0, %1, %cst {dimension_numbers = #tpu.dot_dimension_numbers<[1], [0], [0], [1], [0, 0, 1, 1], [], []>} : vector<32x32xf32>, vector<32x384xf32>, vector<32x384xf32> -> vector<32x384xf32>
    %c0_3 = arith.constant 0 : index
    %c0_4 = arith.constant 0 : index
    %3 = vector.load %arg3[%c0_3, %c0_4] : memref<1x384xf32, #tpu.memory_space<vmem>>, vector<1x384xf32>
    %4 = vector.broadcast %3 : vector<1x384xf32> to vector<32x384xf32>
    %5 = arith.addf %2, %4 : vector<32x384xf32>
    %c0_5 = arith.constant 0 : index
    %c0_6 = arith.constant 0 : index
    %6 = vector.load %arg4[%c0_5, %c0_6] : memref<32x384xf32, #tpu.memory_space<vmem>>, vector<32x384xf32>
    tpu.vector_store %arg4[%c0_5, %c0_6], %5 {strides = array<i32>} : memref<32x384xf32, #tpu.memory_space<vmem>>, vector<32x384xf32>,
    return
  }
  func.func @transform_0(%arg0: i32) -> (i32, i32) {
    %c0_i32 = arith.constant 0 : i32
    %c0_i32_0 = arith.constant 0 : i32
    return %arg0, %c0_i32 : i32, i32
  }
  func.func @transform_1(%arg0: i32) -> (i32, i32) {
    %c0_i32 = arith.constant 0 : i32
    %c0_i32_0 = arith.constant 0 : i32
    %c0_i32_1 = arith.constant 0 : i32
    return %c0_i32, %c0_i32_0 : i32, i32
  }
  func.func @transform_2(%arg0: i32) -> (i32, i32) {
    %c0_i32 = arith.constant 0 : i32
    %c0_i32_0 = arith.constant 0 : i32
    %c0_i32_1 = arith.constant 0 : i32
    return %c0_i32, %c0_i32_0 : i32, i32
  }
  func.func @transform_3(%arg0: i32) -> (i32, i32) {
    %c0_i32 = arith.constant 0 : i32
    %c0_i32_0 = arith.constant 0 : i32
    return %arg0, %c0_i32 : i32, i32
  }
}

module attributes {stable_mosaic.version = 11 : i64} {
  func.func @gru_chunk_kernel(%arg0: i32, %arg1: memref<64x384xf32, #tpu.memory_space<vmem>>, %arg2: memref<64x1xf32, #tpu.memory_space<vmem>>, %arg3: memref<128x384xf32, #tpu.memory_space<vmem>>, %arg4: memref<1x128xf32, #tpu.memory_space<vmem>>, %arg5: memref<64x128xf32, #tpu.memory_space<vmem>>, %arg6: memref<8x128xf32, #tpu.memory_space<vmem>>) attributes {dimension_semantics = [#tpu.dimension_semantics<arbitrary>], iteration_bounds = array<i64: 1>, scalar_prefetch = 0 : i64, scratch_operands = 1 : i64, tpu.core_type = #tpu.core_type<tc>, window_params = [{transform_indices = @transform_0, window_bounds = array<i64: 64, 384>}, {transform_indices = @transform_1, window_bounds = array<i64: 64, 1>}, {pipeline_mode = #tpu.pipeline_mode<synchronous>, transform_indices = @transform_2, window_bounds = array<i64: 128, 384>}, {pipeline_mode = #tpu.pipeline_mode<synchronous>, transform_indices = @transform_3, window_bounds = array<i64: 1, 128>}, {transform_indices = @transform_4, window_bounds = array<i64: 64, 128>}]} {
    %c0_i32 = arith.constant 0 : i32
    %0 = arith.cmpi eq, %arg0, %c0_i32 : i32
    %1 = arith.extui %0 : i1 to i32
    %c0_i32_0 = arith.constant 0 : i32
    %2 = arith.cmpi ne, %1, %c0_i32_0 : i32
    scf.if %2 {
      %cst_72 = arith.constant 0.000000e+00 : f32
      %351 = vector.broadcast %cst_72 : f32 to vector<8x128xf32>
      %c0_73 = arith.constant 0 : index
      %c0_74 = arith.constant 0 : index
      %352 = vector.load %arg6[%c0_73, %c0_74] : memref<8x128xf32, #tpu.memory_space<vmem>>, vector<8x128xf32>
      tpu.vector_store %arg6[%c0_73, %c0_74], %351 {strides = array<i32>} : memref<8x128xf32, #tpu.memory_space<vmem>>, vector<8x128xf32>,
    } else {
    }
    %c0 = arith.constant 0 : index
    %c0_1 = arith.constant 0 : index
    %3 = vector.load %arg3[%c0, %c0_1] : memref<128x384xf32, #tpu.memory_space<vmem>>, vector<128x384xf32>
    %c0_2 = arith.constant 0 : index
    %c0_3 = arith.constant 0 : index
    %4 = vector.load %arg4[%c0_2, %c0_3] : memref<1x128xf32, #tpu.memory_space<vmem>>, vector<1x128xf32>
    %c0_4 = arith.constant 0 : index
    %c0_5 = arith.constant 0 : index
    %5 = vector.load %arg6[%c0_4, %c0_5] : memref<8x128xf32, #tpu.memory_space<vmem>>, vector<8x128xf32>
    %c0_i32_6 = arith.constant 0 : i32
    %c8_i32 = arith.constant 8 : i32
    %6 = arith.muli %c0_i32_6, %c8_i32 : i32
    %7 = tpu.assume_multiple %6, 8 : i32
    %8 = arith.index_cast %7 : i32 to index
    %c0_7 = arith.constant 0 : index
    %9 = vector.load %arg1[%8, %c0_7] : memref<64x384xf32, #tpu.memory_space<vmem>>, vector<8x384xf32>
    %cst = arith.constant dense<0.000000e+00> : vector<8x384xf32>
    %10 = tpu.matmul %5, %3, %cst {dimension_numbers = #tpu.dot_dimension_numbers<[1], [0], [0], [1], [0, 0, 1, 1], [], []>} : vector<8x128xf32>, vector<128x384xf32>, vector<8x384xf32> -> vector<8x384xf32>
    %11 = vector.extract_strided_slice %9 {offsets = [0, 0], sizes = [8, 128], strides = [1, 1]} : vector<8x384xf32> to vector<8x128xf32>
    %12 = vector.extract_strided_slice %10 {offsets = [0, 0], sizes = [8, 128], strides = [1, 1]} : vector<8x384xf32> to vector<8x128xf32>
    %13 = arith.addf %11, %12 : vector<8x128xf32>
    %14 = arith.negf %13 : vector<8x128xf32>
    %15 = math.exp %14 : vector<8x128xf32>
    %cst_8 = arith.constant 1.000000e+00 : f32
    %16 = vector.broadcast %cst_8 : f32 to vector<8x128xf32>
    %17 = arith.addf %16, %15 : vector<8x128xf32>
    %18 = arith.divf %16, %17 : vector<8x128xf32>
    %19 = vector.extract_strided_slice %9 {offsets = [0, 128], sizes = [8, 128], strides = [1, 1]} : vector<8x384xf32> to vector<8x128xf32>
    %20 = vector.extract_strided_slice %10 {offsets = [0, 128], sizes = [8, 128], strides = [1, 1]} : vector<8x384xf32> to vector<8x128xf32>
    %21 = arith.addf %19, %20 : vector<8x128xf32>
    %22 = arith.negf %21 : vector<8x128xf32>
    %23 = math.exp %22 : vector<8x128xf32>
    %cst_9 = arith.constant 1.000000e+00 : f32
    %24 = vector.broadcast %cst_9 : f32 to vector<8x128xf32>
    %25 = arith.addf %24, %23 : vector<8x128xf32>
    %26 = arith.divf %24, %25 : vector<8x128xf32>
    %27 = vector.extract_strided_slice %9 {offsets = [0, 256], sizes = [8, 128], strides = [1, 1]} : vector<8x384xf32> to vector<8x128xf32>
    %28 = vector.extract_strided_slice %10 {offsets = [0, 256], sizes = [8, 128], strides = [1, 1]} : vector<8x384xf32> to vector<8x128xf32>
    %29 = vector.broadcast %4 : vector<1x128xf32> to vector<8x128xf32>
    %30 = arith.addf %28, %29 : vector<8x128xf32>
    %31 = arith.mulf %18, %30 : vector<8x128xf32>
    %32 = arith.addf %27, %31 : vector<8x128xf32>
    %33 = math.tanh %32 : vector<8x128xf32>
    %cst_10 = arith.constant 1.000000e+00 : f32
    %34 = vector.broadcast %cst_10 : f32 to vector<8x128xf32>
    %35 = arith.subf %34, %26 : vector<8x128xf32>
    %36 = arith.mulf %35, %33 : vector<8x128xf32>
    %37 = arith.mulf %26, %5 : vector<8x128xf32>
    %38 = arith.addf %36, %37 : vector<8x128xf32>
    %39 = arith.index_cast %7 : i32 to index
    %c0_11 = arith.constant 0 : index
    %40 = vector.load %arg2[%39, %c0_11] : memref<64x1xf32, #tpu.memory_space<vmem>>, vector<8x1xf32>
    %41 = vector.broadcast %40 : vector<8x1xf32> to vector<8x128xf32>
    %42 = arith.mulf %41, %38 : vector<8x128xf32>
    %43 = arith.index_cast %7 : i32 to index
    %c0_12 = arith.constant 0 : index
    %44 = vector.load %arg5[%43, %c0_12] : memref<64x128xf32, #tpu.memory_space<vmem>>, vector<8x128xf32>
    tpu.vector_store %arg5[%43, %c0_12], %42 {strides = array<i32>} : memref<64x128xf32, #tpu.memory_space<vmem>>, vector<8x128xf32>,
    %45 = arith.subf %38, %5 : vector<8x128xf32>
    %46 = vector.broadcast %40 : vector<8x1xf32> to vector<8x128xf32>
    %47 = arith.mulf %46, %45 : vector<8x128xf32>
    %48 = arith.addf %5, %47 : vector<8x128xf32>
    %c1_i32 = arith.constant 1 : i32
    %c8_i32_13 = arith.constant 8 : i32
    %49 = arith.muli %c1_i32, %c8_i32_13 : i32
    %50 = tpu.assume_multiple %49, 8 : i32
    %51 = arith.index_cast %50 : i32 to index
    %c0_14 = arith.constant 0 : index
    %52 = vector.load %arg1[%51, %c0_14] : memref<64x384xf32, #tpu.memory_space<vmem>>, vector<8x384xf32>
    %cst_15 = arith.constant dense<0.000000e+00> : vector<8x384xf32>
    %53 = tpu.matmul %48, %3, %cst_15 {dimension_numbers = #tpu.dot_dimension_numbers<[1], [0], [0], [1], [0, 0, 1, 1], [], []>} : vector<8x128xf32>, vector<128x384xf32>, vector<8x384xf32> -> vector<8x384xf32>
    %54 = vector.extract_strided_slice %52 {offsets = [0, 0], sizes = [8, 128], strides = [1, 1]} : vector<8x384xf32> to vector<8x128xf32>
    %55 = vector.extract_strided_slice %53 {offsets = [0, 0], sizes = [8, 128], strides = [1, 1]} : vector<8x384xf32> to vector<8x128xf32>
    %56 = arith.addf %54, %55 : vector<8x128xf32>
    %57 = arith.negf %56 : vector<8x128xf32>
    %58 = math.exp %57 : vector<8x128xf32>
    %cst_16 = arith.constant 1.000000e+00 : f32
    %59 = vector.broadcast %cst_16 : f32 to vector<8x128xf32>
    %60 = arith.addf %59, %58 : vector<8x128xf32>
    %61 = arith.divf %59, %60 : vector<8x128xf32>
    %62 = vector.extract_strided_slice %52 {offsets = [0, 128], sizes = [8, 128], strides = [1, 1]} : vector<8x384xf32> to vector<8x128xf32>
    %63 = vector.extract_strided_slice %53 {offsets = [0, 128], sizes = [8, 128], strides = [1, 1]} : vector<8x384xf32> to vector<8x128xf32>
    %64 = arith.addf %62, %63 : vector<8x128xf32>
    %65 = arith.negf %64 : vector<8x128xf32>
    %66 = math.exp %65 : vector<8x128xf32>
    %cst_17 = arith.constant 1.000000e+00 : f32
    %67 = vector.broadcast %cst_17 : f32 to vector<8x128xf32>
    %68 = arith.addf %67, %66 : vector<8x128xf32>
    %69 = arith.divf %67, %68 : vector<8x128xf32>
    %70 = vector.extract_strided_slice %52 {offsets = [0, 256], sizes = [8, 128], strides = [1, 1]} : vector<8x384xf32> to vector<8x128xf32>
    %71 = vector.extract_strided_slice %53 {offsets = [0, 256], sizes = [8, 128], strides = [1, 1]} : vector<8x384xf32> to vector<8x128xf32>
    %72 = vector.broadcast %4 : vector<1x128xf32> to vector<8x128xf32>
    %73 = arith.addf %71, %72 : vector<8x128xf32>
    %74 = arith.mulf %61, %73 : vector<8x128xf32>
    %75 = arith.addf %70, %74 : vector<8x128xf32>
    %76 = math.tanh %75 : vector<8x128xf32>
    %cst_18 = arith.constant 1.000000e+00 : f32
    %77 = vector.broadcast %cst_18 : f32 to vector<8x128xf32>
    %78 = arith.subf %77, %69 : vector<8x128xf32>
    %79 = arith.mulf %78, %76 : vector<8x128xf32>
    %80 = arith.mulf %69, %48 : vector<8x128xf32>
    %81 = arith.addf %79, %80 : vector<8x128xf32>
    %82 = arith.index_cast %50 : i32 to index
    %c0_19 = arith.constant 0 : index
    %83 = vector.load %arg2[%82, %c0_19] : memref<64x1xf32, #tpu.memory_space<vmem>>, vector<8x1xf32>
    %84 = vector.broadcast %83 : vector<8x1xf32> to vector<8x128xf32>
    %85 = arith.mulf %84, %81 : vector<8x128xf32>
    %86 = arith.index_cast %50 : i32 to index
    %c0_20 = arith.constant 0 : index
    %87 = vector.load %arg5[%86, %c0_20] : memref<64x128xf32, #tpu.memory_space<vmem>>, vector<8x128xf32>
    tpu.vector_store %arg5[%86, %c0_20], %85 {strides = array<i32>} : memref<64x128xf32, #tpu.memory_space<vmem>>, vector<8x128xf32>,
    %88 = arith.subf %81, %48 : vector<8x128xf32>
    %89 = vector.broadcast %83 : vector<8x1xf32> to vector<8x128xf32>
    %90 = arith.mulf %89, %88 : vector<8x128xf32>
    %91 = arith.addf %48, %90 : vector<8x128xf32>
    %c2_i32 = arith.constant 2 : i32
    %c8_i32_21 = arith.constant 8 : i32
    %92 = arith.muli %c2_i32, %c8_i32_21 : i32
    %93 = tpu.assume_multiple %92, 8 : i32
    %94 = arith.index_cast %93 : i32 to index
    %c0_22 = arith.constant 0 : index
    %95 = vector.load %arg1[%94, %c0_22] : memref<64x384xf32, #tpu.memory_space<vmem>>, vector<8x384xf32>
    %cst_23 = arith.constant dense<0.000000e+00> : vector<8x384xf32>
    %96 = tpu.matmul %91, %3, %cst_23 {dimension_numbers = #tpu.dot_dimension_numbers<[1], [0], [0], [1], [0, 0, 1, 1], [], []>} : vector<8x128xf32>, vector<128x384xf32>, vector<8x384xf32> -> vector<8x384xf32>
    %97 = vector.extract_strided_slice %95 {offsets = [0, 0], sizes = [8, 128], strides = [1, 1]} : vector<8x384xf32> to vector<8x128xf32>
    %98 = vector.extract_strided_slice %96 {offsets = [0, 0], sizes = [8, 128], strides = [1, 1]} : vector<8x384xf32> to vector<8x128xf32>
    %99 = arith.addf %97, %98 : vector<8x128xf32>
    %100 = arith.negf %99 : vector<8x128xf32>
    %101 = math.exp %100 : vector<8x128xf32>
    %cst_24 = arith.constant 1.000000e+00 : f32
    %102 = vector.broadcast %cst_24 : f32 to vector<8x128xf32>
    %103 = arith.addf %102, %101 : vector<8x128xf32>
    %104 = arith.divf %102, %103 : vector<8x128xf32>
    %105 = vector.extract_strided_slice %95 {offsets = [0, 128], sizes = [8, 128], strides = [1, 1]} : vector<8x384xf32> to vector<8x128xf32>
    %106 = vector.extract_strided_slice %96 {offsets = [0, 128], sizes = [8, 128], strides = [1, 1]} : vector<8x384xf32> to vector<8x128xf32>
    %107 = arith.addf %105, %106 : vector<8x128xf32>
    %108 = arith.negf %107 : vector<8x128xf32>
    %109 = math.exp %108 : vector<8x128xf32>
    %cst_25 = arith.constant 1.000000e+00 : f32
    %110 = vector.broadcast %cst_25 : f32 to vector<8x128xf32>
    %111 = arith.addf %110, %109 : vector<8x128xf32>
    %112 = arith.divf %110, %111 : vector<8x128xf32>
    %113 = vector.extract_strided_slice %95 {offsets = [0, 256], sizes = [8, 128], strides = [1, 1]} : vector<8x384xf32> to vector<8x128xf32>
    %114 = vector.extract_strided_slice %96 {offsets = [0, 256], sizes = [8, 128], strides = [1, 1]} : vector<8x384xf32> to vector<8x128xf32>
    %115 = vector.broadcast %4 : vector<1x128xf32> to vector<8x128xf32>
    %116 = arith.addf %114, %115 : vector<8x128xf32>
    %117 = arith.mulf %104, %116 : vector<8x128xf32>
    %118 = arith.addf %113, %117 : vector<8x128xf32>
    %119 = math.tanh %118 : vector<8x128xf32>
    %cst_26 = arith.constant 1.000000e+00 : f32
    %120 = vector.broadcast %cst_26 : f32 to vector<8x128xf32>
    %121 = arith.subf %120, %112 : vector<8x128xf32>
    %122 = arith.mulf %121, %119 : vector<8x128xf32>
    %123 = arith.mulf %112, %91 : vector<8x128xf32>
    %124 = arith.addf %122, %123 : vector<8x128xf32>
    %125 = arith.index_cast %93 : i32 to index
    %c0_27 = arith.constant 0 : index
    %126 = vector.load %arg2[%125, %c0_27] : memref<64x1xf32, #tpu.memory_space<vmem>>, vector<8x1xf32>
    %127 = vector.broadcast %126 : vector<8x1xf32> to vector<8x128xf32>
    %128 = arith.mulf %127, %124 : vector<8x128xf32>
    %129 = arith.index_cast %93 : i32 to index
    %c0_28 = arith.constant 0 : index
    %130 = vector.load %arg5[%129, %c0_28] : memref<64x128xf32, #tpu.memory_space<vmem>>, vector<8x128xf32>
    tpu.vector_store %arg5[%129, %c0_28], %128 {strides = array<i32>} : memref<64x128xf32, #tpu.memory_space<vmem>>, vector<8x128xf32>,
    %131 = arith.subf %124, %91 : vector<8x128xf32>
    %132 = vector.broadcast %126 : vector<8x1xf32> to vector<8x128xf32>
    %133 = arith.mulf %132, %131 : vector<8x128xf32>
    %134 = arith.addf %91, %133 : vector<8x128xf32>
    %c3_i32 = arith.constant 3 : i32
    %c8_i32_29 = arith.constant 8 : i32
    %135 = arith.muli %c3_i32, %c8_i32_29 : i32
    %136 = tpu.assume_multiple %135, 8 : i32
    %137 = arith.index_cast %136 : i32 to index
    %c0_30 = arith.constant 0 : index
    %138 = vector.load %arg1[%137, %c0_30] : memref<64x384xf32, #tpu.memory_space<vmem>>, vector<8x384xf32>
    %cst_31 = arith.constant dense<0.000000e+00> : vector<8x384xf32>
    %139 = tpu.matmul %134, %3, %cst_31 {dimension_numbers = #tpu.dot_dimension_numbers<[1], [0], [0], [1], [0, 0, 1, 1], [], []>} : vector<8x128xf32>, vector<128x384xf32>, vector<8x384xf32> -> vector<8x384xf32>
    %140 = vector.extract_strided_slice %138 {offsets = [0, 0], sizes = [8, 128], strides = [1, 1]} : vector<8x384xf32> to vector<8x128xf32>
    %141 = vector.extract_strided_slice %139 {offsets = [0, 0], sizes = [8, 128], strides = [1, 1]} : vector<8x384xf32> to vector<8x128xf32>
    %142 = arith.addf %140, %141 : vector<8x128xf32>
    %143 = arith.negf %142 : vector<8x128xf32>
    %144 = math.exp %143 : vector<8x128xf32>
    %cst_32 = arith.constant 1.000000e+00 : f32
    %145 = vector.broadcast %cst_32 : f32 to vector<8x128xf32>
    %146 = arith.addf %145, %144 : vector<8x128xf32>
    %147 = arith.divf %145, %146 : vector<8x128xf32>
    %148 = vector.extract_strided_slice %138 {offsets = [0, 128], sizes = [8, 128], strides = [1, 1]} : vector<8x384xf32> to vector<8x128xf32>
    %149 = vector.extract_strided_slice %139 {offsets = [0, 128], sizes = [8, 128], strides = [1, 1]} : vector<8x384xf32> to vector<8x128xf32>
    %150 = arith.addf %148, %149 : vector<8x128xf32>
    %151 = arith.negf %150 : vector<8x128xf32>
    %152 = math.exp %151 : vector<8x128xf32>
    %cst_33 = arith.constant 1.000000e+00 : f32
    %153 = vector.broadcast %cst_33 : f32 to vector<8x128xf32>
    %154 = arith.addf %153, %152 : vector<8x128xf32>
    %155 = arith.divf %153, %154 : vector<8x128xf32>
    %156 = vector.extract_strided_slice %138 {offsets = [0, 256], sizes = [8, 128], strides = [1, 1]} : vector<8x384xf32> to vector<8x128xf32>
    %157 = vector.extract_strided_slice %139 {offsets = [0, 256], sizes = [8, 128], strides = [1, 1]} : vector<8x384xf32> to vector<8x128xf32>
    %158 = vector.broadcast %4 : vector<1x128xf32> to vector<8x128xf32>
    %159 = arith.addf %157, %158 : vector<8x128xf32>
    %160 = arith.mulf %147, %159 : vector<8x128xf32>
    %161 = arith.addf %156, %160 : vector<8x128xf32>
    %162 = math.tanh %161 : vector<8x128xf32>
    %cst_34 = arith.constant 1.000000e+00 : f32
    %163 = vector.broadcast %cst_34 : f32 to vector<8x128xf32>
    %164 = arith.subf %163, %155 : vector<8x128xf32>
    %165 = arith.mulf %164, %162 : vector<8x128xf32>
    %166 = arith.mulf %155, %134 : vector<8x128xf32>
    %167 = arith.addf %165, %166 : vector<8x128xf32>
    %168 = arith.index_cast %136 : i32 to index
    %c0_35 = arith.constant 0 : index
    %169 = vector.load %arg2[%168, %c0_35] : memref<64x1xf32, #tpu.memory_space<vmem>>, vector<8x1xf32>
    %170 = vector.broadcast %169 : vector<8x1xf32> to vector<8x128xf32>
    %171 = arith.mulf %170, %167 : vector<8x128xf32>
    %172 = arith.index_cast %136 : i32 to index
    %c0_36 = arith.constant 0 : index
    %173 = vector.load %arg5[%172, %c0_36] : memref<64x128xf32, #tpu.memory_space<vmem>>, vector<8x128xf32>
    tpu.vector_store %arg5[%172, %c0_36], %171 {strides = array<i32>} : memref<64x128xf32, #tpu.memory_space<vmem>>, vector<8x128xf32>,
    %174 = arith.subf %167, %134 : vector<8x128xf32>
    %175 = vector.broadcast %169 : vector<8x1xf32> to vector<8x128xf32>
    %176 = arith.mulf %175, %174 : vector<8x128xf32>
    %177 = arith.addf %134, %176 : vector<8x128xf32>
    %c4_i32 = arith.constant 4 : i32
    %c8_i32_37 = arith.constant 8 : i32
    %178 = arith.muli %c4_i32, %c8_i32_37 : i32
    %179 = tpu.assume_multiple %178, 8 : i32
    %180 = arith.index_cast %179 : i32 to index
    %c0_38 = arith.constant 0 : index
    %181 = vector.load %arg1[%180, %c0_38] : memref<64x384xf32, #tpu.memory_space<vmem>>, vector<8x384xf32>
    %cst_39 = arith.constant dense<0.000000e+00> : vector<8x384xf32>
    %182 = tpu.matmul %177, %3, %cst_39 {dimension_numbers = #tpu.dot_dimension_numbers<[1], [0], [0], [1], [0, 0, 1, 1], [], []>} : vector<8x128xf32>, vector<128x384xf32>, vector<8x384xf32> -> vector<8x384xf32>
    %183 = vector.extract_strided_slice %181 {offsets = [0, 0], sizes = [8, 128], strides = [1, 1]} : vector<8x384xf32> to vector<8x128xf32>
    %184 = vector.extract_strided_slice %182 {offsets = [0, 0], sizes = [8, 128], strides = [1, 1]} : vector<8x384xf32> to vector<8x128xf32>
    %185 = arith.addf %183, %184 : vector<8x128xf32>
    %186 = arith.negf %185 : vector<8x128xf32>
    %187 = math.exp %186 : vector<8x128xf32>
    %cst_40 = arith.constant 1.000000e+00 : f32
    %188 = vector.broadcast %cst_40 : f32 to vector<8x128xf32>
    %189 = arith.addf %188, %187 : vector<8x128xf32>
    %190 = arith.divf %188, %189 : vector<8x128xf32>
    %191 = vector.extract_strided_slice %181 {offsets = [0, 128], sizes = [8, 128], strides = [1, 1]} : vector<8x384xf32> to vector<8x128xf32>
    %192 = vector.extract_strided_slice %182 {offsets = [0, 128], sizes = [8, 128], strides = [1, 1]} : vector<8x384xf32> to vector<8x128xf32>
    %193 = arith.addf %191, %192 : vector<8x128xf32>
    %194 = arith.negf %193 : vector<8x128xf32>
    %195 = math.exp %194 : vector<8x128xf32>
    %cst_41 = arith.constant 1.000000e+00 : f32
    %196 = vector.broadcast %cst_41 : f32 to vector<8x128xf32>
    %197 = arith.addf %196, %195 : vector<8x128xf32>
    %198 = arith.divf %196, %197 : vector<8x128xf32>
    %199 = vector.extract_strided_slice %181 {offsets = [0, 256], sizes = [8, 128], strides = [1, 1]} : vector<8x384xf32> to vector<8x128xf32>
    %200 = vector.extract_strided_slice %182 {offsets = [0, 256], sizes = [8, 128], strides = [1, 1]} : vector<8x384xf32> to vector<8x128xf32>
    %201 = vector.broadcast %4 : vector<1x128xf32> to vector<8x128xf32>
    %202 = arith.addf %200, %201 : vector<8x128xf32>
    %203 = arith.mulf %190, %202 : vector<8x128xf32>
    %204 = arith.addf %199, %203 : vector<8x128xf32>
    %205 = math.tanh %204 : vector<8x128xf32>
    %cst_42 = arith.constant 1.000000e+00 : f32
    %206 = vector.broadcast %cst_42 : f32 to vector<8x128xf32>
    %207 = arith.subf %206, %198 : vector<8x128xf32>
    %208 = arith.mulf %207, %205 : vector<8x128xf32>
    %209 = arith.mulf %198, %177 : vector<8x128xf32>
    %210 = arith.addf %208, %209 : vector<8x128xf32>
    %211 = arith.index_cast %179 : i32 to index
    %c0_43 = arith.constant 0 : index
    %212 = vector.load %arg2[%211, %c0_43] : memref<64x1xf32, #tpu.memory_space<vmem>>, vector<8x1xf32>
    %213 = vector.broadcast %212 : vector<8x1xf32> to vector<8x128xf32>
    %214 = arith.mulf %213, %210 : vector<8x128xf32>
    %215 = arith.index_cast %179 : i32 to index
    %c0_44 = arith.constant 0 : index
    %216 = vector.load %arg5[%215, %c0_44] : memref<64x128xf32, #tpu.memory_space<vmem>>, vector<8x128xf32>
    tpu.vector_store %arg5[%215, %c0_44], %214 {strides = array<i32>} : memref<64x128xf32, #tpu.memory_space<vmem>>, vector<8x128xf32>,
    %217 = arith.subf %210, %177 : vector<8x128xf32>
    %218 = vector.broadcast %212 : vector<8x1xf32> to vector<8x128xf32>
    %219 = arith.mulf %218, %217 : vector<8x128xf32>
    %220 = arith.addf %177, %219 : vector<8x128xf32>
    %c5_i32 = arith.constant 5 : i32
    %c8_i32_45 = arith.constant 8 : i32
    %221 = arith.muli %c5_i32, %c8_i32_45 : i32
    %222 = tpu.assume_multiple %221, 8 : i32
    %223 = arith.index_cast %222 : i32 to index
    %c0_46 = arith.constant 0 : index
    %224 = vector.load %arg1[%223, %c0_46] : memref<64x384xf32, #tpu.memory_space<vmem>>, vector<8x384xf32>
    %cst_47 = arith.constant dense<0.000000e+00> : vector<8x384xf32>
    %225 = tpu.matmul %220, %3, %cst_47 {dimension_numbers = #tpu.dot_dimension_numbers<[1], [0], [0], [1], [0, 0, 1, 1], [], []>} : vector<8x128xf32>, vector<128x384xf32>, vector<8x384xf32> -> vector<8x384xf32>
    %226 = vector.extract_strided_slice %224 {offsets = [0, 0], sizes = [8, 128], strides = [1, 1]} : vector<8x384xf32> to vector<8x128xf32>
    %227 = vector.extract_strided_slice %225 {offsets = [0, 0], sizes = [8, 128], strides = [1, 1]} : vector<8x384xf32> to vector<8x128xf32>
    %228 = arith.addf %226, %227 : vector<8x128xf32>
    %229 = arith.negf %228 : vector<8x128xf32>
    %230 = math.exp %229 : vector<8x128xf32>
    %cst_48 = arith.constant 1.000000e+00 : f32
    %231 = vector.broadcast %cst_48 : f32 to vector<8x128xf32>
    %232 = arith.addf %231, %230 : vector<8x128xf32>
    %233 = arith.divf %231, %232 : vector<8x128xf32>
    %234 = vector.extract_strided_slice %224 {offsets = [0, 128], sizes = [8, 128], strides = [1, 1]} : vector<8x384xf32> to vector<8x128xf32>
    %235 = vector.extract_strided_slice %225 {offsets = [0, 128], sizes = [8, 128], strides = [1, 1]} : vector<8x384xf32> to vector<8x128xf32>
    %236 = arith.addf %234, %235 : vector<8x128xf32>
    %237 = arith.negf %236 : vector<8x128xf32>
    %238 = math.exp %237 : vector<8x128xf32>
    %cst_49 = arith.constant 1.000000e+00 : f32
    %239 = vector.broadcast %cst_49 : f32 to vector<8x128xf32>
    %240 = arith.addf %239, %238 : vector<8x128xf32>
    %241 = arith.divf %239, %240 : vector<8x128xf32>
    %242 = vector.extract_strided_slice %224 {offsets = [0, 256], sizes = [8, 128], strides = [1, 1]} : vector<8x384xf32> to vector<8x128xf32>
    %243 = vector.extract_strided_slice %225 {offsets = [0, 256], sizes = [8, 128], strides = [1, 1]} : vector<8x384xf32> to vector<8x128xf32>
    %244 = vector.broadcast %4 : vector<1x128xf32> to vector<8x128xf32>
    %245 = arith.addf %243, %244 : vector<8x128xf32>
    %246 = arith.mulf %233, %245 : vector<8x128xf32>
    %247 = arith.addf %242, %246 : vector<8x128xf32>
    %248 = math.tanh %247 : vector<8x128xf32>
    %cst_50 = arith.constant 1.000000e+00 : f32
    %249 = vector.broadcast %cst_50 : f32 to vector<8x128xf32>
    %250 = arith.subf %249, %241 : vector<8x128xf32>
    %251 = arith.mulf %250, %248 : vector<8x128xf32>
    %252 = arith.mulf %241, %220 : vector<8x128xf32>
    %253 = arith.addf %251, %252 : vector<8x128xf32>
    %254 = arith.index_cast %222 : i32 to index
    %c0_51 = arith.constant 0 : index
    %255 = vector.load %arg2[%254, %c0_51] : memref<64x1xf32, #tpu.memory_space<vmem>>, vector<8x1xf32>
    %256 = vector.broadcast %255 : vector<8x1xf32> to vector<8x128xf32>
    %257 = arith.mulf %256, %253 : vector<8x128xf32>
    %258 = arith.index_cast %222 : i32 to index
    %c0_52 = arith.constant 0 : index
    %259 = vector.load %arg5[%258, %c0_52] : memref<64x128xf32, #tpu.memory_space<vmem>>, vector<8x128xf32>
    tpu.vector_store %arg5[%258, %c0_52], %257 {strides = array<i32>} : memref<64x128xf32, #tpu.memory_space<vmem>>, vector<8x128xf32>,
    %260 = arith.subf %253, %220 : vector<8x128xf32>
    %261 = vector.broadcast %255 : vector<8x1xf32> to vector<8x128xf32>
    %262 = arith.mulf %261, %260 : vector<8x128xf32>
    %263 = arith.addf %220, %262 : vector<8x128xf32>
    %c6_i32 = arith.constant 6 : i32
    %c8_i32_53 = arith.constant 8 : i32
    %264 = arith.muli %c6_i32, %c8_i32_53 : i32
    %265 = tpu.assume_multiple %264, 8 : i32
    %266 = arith.index_cast %265 : i32 to index
    %c0_54 = arith.constant 0 : index
    %267 = vector.load %arg1[%266, %c0_54] : memref<64x384xf32, #tpu.memory_space<vmem>>, vector<8x384xf32>
    %cst_55 = arith.constant dense<0.000000e+00> : vector<8x384xf32>
    %268 = tpu.matmul %263, %3, %cst_55 {dimension_numbers = #tpu.dot_dimension_numbers<[1], [0], [0], [1], [0, 0, 1, 1], [], []>} : vector<8x128xf32>, vector<128x384xf32>, vector<8x384xf32> -> vector<8x384xf32>
    %269 = vector.extract_strided_slice %267 {offsets = [0, 0], sizes = [8, 128], strides = [1, 1]} : vector<8x384xf32> to vector<8x128xf32>
    %270 = vector.extract_strided_slice %268 {offsets = [0, 0], sizes = [8, 128], strides = [1, 1]} : vector<8x384xf32> to vector<8x128xf32>
    %271 = arith.addf %269, %270 : vector<8x128xf32>
    %272 = arith.negf %271 : vector<8x128xf32>
    %273 = math.exp %272 : vector<8x128xf32>
    %cst_56 = arith.constant 1.000000e+00 : f32
    %274 = vector.broadcast %cst_56 : f32 to vector<8x128xf32>
    %275 = arith.addf %274, %273 : vector<8x128xf32>
    %276 = arith.divf %274, %275 : vector<8x128xf32>
    %277 = vector.extract_strided_slice %267 {offsets = [0, 128], sizes = [8, 128], strides = [1, 1]} : vector<8x384xf32> to vector<8x128xf32>
    %278 = vector.extract_strided_slice %268 {offsets = [0, 128], sizes = [8, 128], strides = [1, 1]} : vector<8x384xf32> to vector<8x128xf32>
    %279 = arith.addf %277, %278 : vector<8x128xf32>
    %280 = arith.negf %279 : vector<8x128xf32>
    %281 = math.exp %280 : vector<8x128xf32>
    %cst_57 = arith.constant 1.000000e+00 : f32
    %282 = vector.broadcast %cst_57 : f32 to vector<8x128xf32>
    %283 = arith.addf %282, %281 : vector<8x128xf32>
    %284 = arith.divf %282, %283 : vector<8x128xf32>
    %285 = vector.extract_strided_slice %267 {offsets = [0, 256], sizes = [8, 128], strides = [1, 1]} : vector<8x384xf32> to vector<8x128xf32>
    %286 = vector.extract_strided_slice %268 {offsets = [0, 256], sizes = [8, 128], strides = [1, 1]} : vector<8x384xf32> to vector<8x128xf32>
    %287 = vector.broadcast %4 : vector<1x128xf32> to vector<8x128xf32>
    %288 = arith.addf %286, %287 : vector<8x128xf32>
    %289 = arith.mulf %276, %288 : vector<8x128xf32>
    %290 = arith.addf %285, %289 : vector<8x128xf32>
    %291 = math.tanh %290 : vector<8x128xf32>
    %cst_58 = arith.constant 1.000000e+00 : f32
    %292 = vector.broadcast %cst_58 : f32 to vector<8x128xf32>
    %293 = arith.subf %292, %284 : vector<8x128xf32>
    %294 = arith.mulf %293, %291 : vector<8x128xf32>
    %295 = arith.mulf %284, %263 : vector<8x128xf32>
    %296 = arith.addf %294, %295 : vector<8x128xf32>
    %297 = arith.index_cast %265 : i32 to index
    %c0_59 = arith.constant 0 : index
    %298 = vector.load %arg2[%297, %c0_59] : memref<64x1xf32, #tpu.memory_space<vmem>>, vector<8x1xf32>
    %299 = vector.broadcast %298 : vector<8x1xf32> to vector<8x128xf32>
    %300 = arith.mulf %299, %296 : vector<8x128xf32>
    %301 = arith.index_cast %265 : i32 to index
    %c0_60 = arith.constant 0 : index
    %302 = vector.load %arg5[%301, %c0_60] : memref<64x128xf32, #tpu.memory_space<vmem>>, vector<8x128xf32>
    tpu.vector_store %arg5[%301, %c0_60], %300 {strides = array<i32>} : memref<64x128xf32, #tpu.memory_space<vmem>>, vector<8x128xf32>,
    %303 = arith.subf %296, %263 : vector<8x128xf32>
    %304 = vector.broadcast %298 : vector<8x1xf32> to vector<8x128xf32>
    %305 = arith.mulf %304, %303 : vector<8x128xf32>
    %306 = arith.addf %263, %305 : vector<8x128xf32>
    %c7_i32 = arith.constant 7 : i32
    %c8_i32_61 = arith.constant 8 : i32
    %307 = arith.muli %c7_i32, %c8_i32_61 : i32
    %308 = tpu.assume_multiple %307, 8 : i32
    %309 = arith.index_cast %308 : i32 to index
    %c0_62 = arith.constant 0 : index
    %310 = vector.load %arg1[%309, %c0_62] : memref<64x384xf32, #tpu.memory_space<vmem>>, vector<8x384xf32>
    %cst_63 = arith.constant dense<0.000000e+00> : vector<8x384xf32>
    %311 = tpu.matmul %306, %3, %cst_63 {dimension_numbers = #tpu.dot_dimension_numbers<[1], [0], [0], [1], [0, 0, 1, 1], [], []>} : vector<8x128xf32>, vector<128x384xf32>, vector<8x384xf32> -> vector<8x384xf32>
    %312 = vector.extract_strided_slice %310 {offsets = [0, 0], sizes = [8, 128], strides = [1, 1]} : vector<8x384xf32> to vector<8x128xf32>
    %313 = vector.extract_strided_slice %311 {offsets = [0, 0], sizes = [8, 128], strides = [1, 1]} : vector<8x384xf32> to vector<8x128xf32>
    %314 = arith.addf %312, %313 : vector<8x128xf32>
    %315 = arith.negf %314 : vector<8x128xf32>
    %316 = math.exp %315 : vector<8x128xf32>
    %cst_64 = arith.constant 1.000000e+00 : f32
    %317 = vector.broadcast %cst_64 : f32 to vector<8x128xf32>
    %318 = arith.addf %317, %316 : vector<8x128xf32>
    %319 = arith.divf %317, %318 : vector<8x128xf32>
    %320 = vector.extract_strided_slice %310 {offsets = [0, 128], sizes = [8, 128], strides = [1, 1]} : vector<8x384xf32> to vector<8x128xf32>
    %321 = vector.extract_strided_slice %311 {offsets = [0, 128], sizes = [8, 128], strides = [1, 1]} : vector<8x384xf32> to vector<8x128xf32>
    %322 = arith.addf %320, %321 : vector<8x128xf32>
    %323 = arith.negf %322 : vector<8x128xf32>
    %324 = math.exp %323 : vector<8x128xf32>
    %cst_65 = arith.constant 1.000000e+00 : f32
    %325 = vector.broadcast %cst_65 : f32 to vector<8x128xf32>
    %326 = arith.addf %325, %324 : vector<8x128xf32>
    %327 = arith.divf %325, %326 : vector<8x128xf32>
    %328 = vector.extract_strided_slice %310 {offsets = [0, 256], sizes = [8, 128], strides = [1, 1]} : vector<8x384xf32> to vector<8x128xf32>
    %329 = vector.extract_strided_slice %311 {offsets = [0, 256], sizes = [8, 128], strides = [1, 1]} : vector<8x384xf32> to vector<8x128xf32>
    %330 = vector.broadcast %4 : vector<1x128xf32> to vector<8x128xf32>
    %331 = arith.addf %329, %330 : vector<8x128xf32>
    %332 = arith.mulf %319, %331 : vector<8x128xf32>
    %333 = arith.addf %328, %332 : vector<8x128xf32>
    %334 = math.tanh %333 : vector<8x128xf32>
    %cst_66 = arith.constant 1.000000e+00 : f32
    %335 = vector.broadcast %cst_66 : f32 to vector<8x128xf32>
    %336 = arith.subf %335, %327 : vector<8x128xf32>
    %337 = arith.mulf %336, %334 : vector<8x128xf32>
    %338 = arith.mulf %327, %306 : vector<8x128xf32>
    %339 = arith.addf %337, %338 : vector<8x128xf32>
    %340 = arith.index_cast %308 : i32 to index
    %c0_67 = arith.constant 0 : index
    %341 = vector.load %arg2[%340, %c0_67] : memref<64x1xf32, #tpu.memory_space<vmem>>, vector<8x1xf32>
    %342 = vector.broadcast %341 : vector<8x1xf32> to vector<8x128xf32>
    %343 = arith.mulf %342, %339 : vector<8x128xf32>
    %344 = arith.index_cast %308 : i32 to index
    %c0_68 = arith.constant 0 : index
    %345 = vector.load %arg5[%344, %c0_68] : memref<64x128xf32, #tpu.memory_space<vmem>>, vector<8x128xf32>
    tpu.vector_store %arg5[%344, %c0_68], %343 {strides = array<i32>} : memref<64x128xf32, #tpu.memory_space<vmem>>, vector<8x128xf32>,
    %346 = arith.subf %339, %306 : vector<8x128xf32>
    %347 = vector.broadcast %341 : vector<8x1xf32> to vector<8x128xf32>
    %348 = arith.mulf %347, %346 : vector<8x128xf32>
    %349 = arith.addf %306, %348 : vector<8x128xf32>
    %c8_i32_69 = arith.constant 8 : i32
    %c0_70 = arith.constant 0 : index
    %c0_71 = arith.constant 0 : index
    %350 = vector.load %arg6[%c0_70, %c0_71] : memref<8x128xf32, #tpu.memory_space<vmem>>, vector<8x128xf32>
    tpu.vector_store %arg6[%c0_70, %c0_71], %349 {strides = array<i32>} : memref<8x128xf32, #tpu.memory_space<vmem>>, vector<8x128xf32>,
    return
  }
  func.func @transform_0(%arg0: i32) -> (i32, i32) {
    %c0_i32 = arith.constant 0 : i32
    %c0_i32_0 = arith.constant 0 : i32
    return %arg0, %c0_i32 : i32, i32
  }
  func.func @transform_1(%arg0: i32) -> (i32, i32) {
    %c0_i32 = arith.constant 0 : i32
    %c0_i32_0 = arith.constant 0 : i32
    return %arg0, %c0_i32 : i32, i32
  }
  func.func @transform_2(%arg0: i32) -> (i32, i32) {
    %c0_i32 = arith.constant 0 : i32
    %c0_i32_0 = arith.constant 0 : i32
    %c0_i32_1 = arith.constant 0 : i32
    return %c0_i32, %c0_i32_0 : i32, i32
  }
  func.func @transform_3(%arg0: i32) -> (i32, i32) {
    %c0_i32 = arith.constant 0 : i32
    %c0_i32_0 = arith.constant 0 : i32
    %c0_i32_1 = arith.constant 0 : i32
    return %c0_i32, %c0_i32_0 : i32, i32
  }
  func.func @transform_4(%arg0: i32) -> (i32, i32) {
    %c0_i32 = arith.constant 0 : i32
    %c0_i32_0 = arith.constant 0 : i32
    return %arg0, %c0_i32 : i32, i32
  }
}

module attributes {stable_mosaic.version = 11 : i64} {
  func.func @dec_kernel(%arg0: i32, %arg1: i32, %arg2: memref<32x128xf32, #tpu.memory_space<vmem>>, %arg3: memref<128x128xf32, #tpu.memory_space<vmem>>, %arg4: memref<1x128xf32, #tpu.memory_space<vmem>>, %arg5: memref<128x128xbf16, #tpu.memory_space<vmem>>, %arg6: memref<1x128xf32, #tpu.memory_space<vmem>>, %arg7: memref<32x128xf32, #tpu.memory_space<vmem>>, %arg8: memref<32x128xbf16, #tpu.memory_space<vmem>>) attributes {dimension_semantics = [#tpu.dimension_semantics<parallel>, #tpu.dimension_semantics<arbitrary>], iteration_bounds = array<i64: 2, 1>, scalar_prefetch = 0 : i64, scratch_operands = 1 : i64, tpu.core_type = #tpu.core_type<tc>, window_params = [{transform_indices = @transform_0, window_bounds = array<i64: 32, 128>}, {pipeline_mode = #tpu.pipeline_mode<synchronous>, transform_indices = @transform_1, window_bounds = array<i64: 128, 128>}, {pipeline_mode = #tpu.pipeline_mode<synchronous>, transform_indices = @transform_2, window_bounds = array<i64: 1, 128>}, {transform_indices = @transform_3, window_bounds = array<i64: 128, 128>}, {transform_indices = @transform_4, window_bounds = array<i64: 1, 128>}, {transform_indices = @transform_5, window_bounds = array<i64: 32, 128>}]} {
    %c0_i32 = arith.constant 0 : i32
    %0 = arith.cmpi eq, %arg1, %c0_i32 : i32
    %1 = arith.extui %0 : i1 to i32
    %c0_i32_0 = arith.constant 0 : i32
    %2 = arith.cmpi ne, %1, %c0_i32_0 : i32
    scf.if %2 {
      %c0_8 = arith.constant 0 : index
      %c0_9 = arith.constant 0 : index
      %10 = vector.load %arg2[%c0_8, %c0_9] : memref<32x128xf32, #tpu.memory_space<vmem>>, vector<32x128xf32>
      %c0_10 = arith.constant 0 : index
      %c0_11 = arith.constant 0 : index
      %11 = vector.load %arg3[%c0_10, %c0_11] : memref<128x128xf32, #tpu.memory_space<vmem>>, vector<128x128xf32>
      %cst_12 = arith.constant dense<0.000000e+00> : vector<32x128xf32>
      %12 = tpu.matmul %10, %11, %cst_12 {dimension_numbers = #tpu.dot_dimension_numbers<[1], [0], [0], [1], [0, 0, 1, 1], [], []>} : vector<32x128xf32>, vector<128x128xf32>, vector<32x128xf32> -> vector<32x128xf32>
      %c0_13 = arith.constant 0 : index
      %c0_14 = arith.constant 0 : index
      %13 = vector.load %arg4[%c0_13, %c0_14] : memref<1x128xf32, #tpu.memory_space<vmem>>, vector<1x128xf32>
      %14 = vector.broadcast %13 : vector<1x128xf32> to vector<32x128xf32>
      %15 = arith.addf %12, %14 : vector<32x128xf32>
      %16 = math.tanh %15 : vector<32x128xf32>
      %17 = arith.truncf %16 : vector<32x128xf32> to vector<32x128xbf16>
      %c0_15 = arith.constant 0 : index
      %c0_16 = arith.constant 0 : index
      %18 = vector.load %arg8[%c0_15, %c0_16] : memref<32x128xbf16, #tpu.memory_space<vmem>>, vector<32x128xbf16>
      tpu.vector_store %arg8[%c0_15, %c0_16], %17 {strides = array<i32>} : memref<32x128xbf16, #tpu.memory_space<vmem>>, vector<32x128xbf16>,
    } else {
    }
    %c0 = arith.constant 0 : index
    %c0_1 = arith.constant 0 : index
    %3 = vector.load %arg8[%c0, %c0_1] : memref<32x128xbf16, #tpu.memory_space<vmem>>, vector<32x128xbf16>
    %c0_2 = arith.constant 0 : index
    %c0_3 = arith.constant 0 : index
    %4 = vector.load %arg5[%c0_2, %c0_3] : memref<128x128xbf16, #tpu.memory_space<vmem>>, vector<128x128xbf16>
    %cst = arith.constant dense<0.000000e+00> : vector<32x128xf32>
    %5 = tpu.matmul %3, %4, %cst {dimension_numbers = #tpu.dot_dimension_numbers<[1], [0], [0], [1], [0, 0, 1, 1], [], []>} : vector<32x128xbf16>, vector<128x128xbf16>, vector<32x128xf32> -> vector<32x128xf32>
    %c0_4 = arith.constant 0 : index
    %c0_5 = arith.constant 0 : index
    %6 = vector.load %arg6[%c0_4, %c0_5] : memref<1x128xf32, #tpu.memory_space<vmem>>, vector<1x128xf32>
    %7 = vector.broadcast %6 : vector<1x128xf32> to vector<32x128xf32>
    %8 = arith.addf %5, %7 : vector<32x128xf32>
    %c0_6 = arith.constant 0 : index
    %c0_7 = arith.constant 0 : index
    %9 = vector.load %arg7[%c0_6, %c0_7] : memref<32x128xf32, #tpu.memory_space<vmem>>, vector<32x128xf32>
    tpu.vector_store %arg7[%c0_6, %c0_7], %8 {strides = array<i32>} : memref<32x128xf32, #tpu.memory_space<vmem>>, vector<32x128xf32>,
    return
  }
  func.func @transform_0(%arg0: i32, %arg1: i32) -> (i32, i32) {
    %c0_i32 = arith.constant 0 : i32
    %c0_i32_0 = arith.constant 0 : i32
    return %arg0, %c0_i32 : i32, i32
  }
  func.func @transform_1(%arg0: i32, %arg1: i32) -> (i32, i32) {
    %c0_i32 = arith.constant 0 : i32
    %c0_i32_0 = arith.constant 0 : i32
    %c0_i32_1 = arith.constant 0 : i32
    return %c0_i32, %c0_i32_0 : i32, i32
  }
  func.func @transform_2(%arg0: i32, %arg1: i32) -> (i32, i32) {
    %c0_i32 = arith.constant 0 : i32
    %c0_i32_0 = arith.constant 0 : i32
    %c0_i32_1 = arith.constant 0 : i32
    return %c0_i32, %c0_i32_0 : i32, i32
  }
  func.func @transform_3(%arg0: i32, %arg1: i32) -> (i32, i32) {
    %c0_i32 = arith.constant 0 : i32
    %c0_i32_0 = arith.constant 0 : i32
    return %c0_i32, %arg1 : i32, i32
  }
  func.func @transform_4(%arg0: i32, %arg1: i32) -> (i32, i32) {
    %c0_i32 = arith.constant 0 : i32
    %c0_i32_0 = arith.constant 0 : i32
    return %c0_i32, %arg1 : i32, i32
  }
  func.func @transform_5(%arg0: i32, %arg1: i32) -> (i32, i32) {
    %c0_i32 = arith.constant 0 : i32
    return %arg0, %arg1 : i32, i32
  }
}

</mosaic_0001>

<bundles_post_ra>
// kernel: model_mld_forward.7
= control target key start
LH: loop header
LB: loop body
LE: loop exit
PB: predicated region body
PF: predicated region fallthrough
CT: control target
= control target key end

     0   :  { %s1356_s30 = smov 0   ;;  %s1601_s0 = inlined_call_operand.vmem [shape: f32[64,128], index: 0, kind: input, shape index: {}]   ;;  %s1602_s1 = inlined_call_operand.vmem [shape: f32[64,64], index: 1, kind: input, shape index: {}]   ;;  %s1603_s2 = inlined_call_operand.vmem [shape: f32[128,128], index: 2, kind: input, shape index: {}]   ;;  %s1604_s3 = inlined_call_operand.vmem [shape: f32[1,128], index: 3, kind: input, shape index: {}]   ;;  %s1605_s4 = inlined_call_operand.vmem [shape: f32[128,128], index: 4, kind: input, shape index: {}]   ;;  %s1606_s5 = inlined_call_operand.vmem [shape: f32[1,128], index: 5, kind: input, shape index: {}]   ;;  %s1607_s6 = inlined_call_operand.vmem [shape: f32[64,384], index: 6, kind: input, shape index: {}]   ;;  %s1608_s7 = inlined_call_operand.vmem [shape: f32[1,384], index: 7, kind: input, shape index: {}]   ;;  %s1609_s8 = inlined_call_operand.vmem [shape: f32[64,128], index: 8, kind: output, shape index: {0}]   ;;  %s1610_s9 = inlined_call_operand.vmem [shape: f32[64,384], index: 9, kind: output, shape index: {1}]  }
   0x1 LB: > { %s998_s10 = sadd.s32 4294967295, %s1302_s30   ;;  %p1002_p0 = scmp.ge.s32.totalorder %s1302_s30, 1  ;;  %s1302_s30 = sphi %s1356_s30, %s20_s30  }
   0x2   : > { %p302_p1 = scmp.lt.s32.totalorder %s1302_s30, 3 }
   0x4   : > { %p303_p2 = pnand %p1002_p0, %p302_p1 }
   0x5   : > { %v378_v0 = vld [vmem:[%s1603_s2] sm:$0xff] (!%p303_p2)  ;;  %v379_v1 = vld [vmem:[%s1603_s2 + $0x8] sm:$0xff] (!%p303_p2)  ;;  %v380_v2 = vld [vmem:[%s1603_s2 + $0x10] sm:$0xff] (!%p303_p2)  ;;  %s1003_s17 = sshll.u32 (!%p303_p2), %s998_s10, 2  ;;  %s1304_s10 = smov (!%p303_p2), 64   ;;  %vm695_vm0 = vcmask (!%p303_p2), 523264  }
   0x6   : > { %306 = sbr.rel (%p303_p2) target bundleno = 842 (0x34a), region = 52  ;;  %v1173_v3 = vpack.c.bf16 (!%p303_p2), %v379_v1, %v378_v0  ;;  %v381_v4 = vld [vmem:[%s1603_s2 + $0x18] sm:$0xff] (!%p303_p2)  ;;  %p350_p3 = scmp.lt.s32.totalorder (!%p303_p2), %s1003_s17, 7  ;;  %v382_v6 = vld [vmem:[%s1603_s2 + $0x20] sm:$0xff] (!%p303_p2)  ;;  %v383_v7 = vld [vmem:[%s1603_s2 + $0x28] sm:$0xff] (!%p303_p2) }
   0x7   : > { %v1177_v5 = vpack.c.bf16 (!%p303_p2), %v381_v4, %v380_v2  ;;  %v1181_v8 = vpack.c.bf16 (!%p303_p2), %v383_v7, %v382_v6  ;;  %v384_v9 = vld [vmem:[%s1603_s2 + $0x30] sm:$0xff] (!%p303_p2)  ;;  %v490_v10 = vld [vmem:[%s1605_s4] sm:$0xff] (!%p303_p2)  ;;  %v491_v11 = vld [vmem:[%s1605_s4 + $0x8] sm:$0xff] (!%p303_p2) }
   0x8   : > { %1174 = vmatprep.subr.bf16.mxu0 (!%p303_p2), %v1173_v3  ;;  %v385_v12 = vld [vmem:[%s1603_s2 + $0x38] sm:$0xff] (!%p303_p2)  ;;  %v1205_v13 = vpack.c.bf16 (!%p303_p2), %v491_v11, %v490_v10  ;;  %v492_v14 = vld [vmem:[%s1605_s4 + $0x10] sm:$0xff] (!%p303_p2)  ;;  %v494_v18 = vld [vmem:[%s1605_s4 + $0x20] sm:$0xff] (!%p303_p2) }
   0x9   : > { %1176 = vmatpush3.bf16.msra.mxu0 (!%p303_p2), %v1173_v3  ;;  %v493_v15 = vld [vmem:[%s1605_s4 + $0x18] sm:$0xff] (!%p303_p2)  ;;  %v495_v19 = vld [vmem:[%s1605_s4 + $0x28] sm:$0xff] (!%p303_p2)  ;;  %v1185_v20 = vpack.c.bf16 (!%p303_p2), %v385_v12, %v384_v9  ;;  %v386_v21 = vld [vmem:[%s1603_s2 + $0x40] sm:$0xff] (!%p303_p2) }
   0xa   : > { %1178 = vmatprep.subr.bf16.mxu0 (!%p303_p2), %v1177_v5  ;;  %v1209_v17 = vpack.c.bf16 (!%p303_p2), %v493_v15, %v492_v14  ;;  %1206 = vmatprep.subr.bf16.mxu1 (!%p303_p2), %v1205_v13  ;;  %v387_v22 = vld [vmem:[%s1603_s2 + $0x48] sm:$0xff] (!%p303_p2)  ;;  %v1213_v23 = vpack.c.bf16 (!%p303_p2), %v495_v19, %v494_v18  ;;  %v496_v24 = vld [vmem:[%s1605_s4 + $0x30] sm:$0xff] (!%p303_p2)  ;;  %v497_v25 = vld [vmem:[%s1605_s4 + $0x38] sm:$0xff] (!%p303_p2) }
   0xb   : > { %1208 = vmatpush3.bf16.msra.mxu1 (!%p303_p2), %v1205_v13  ;;  %v1189_v26 = vpack.c.bf16 (!%p303_p2), %v387_v22, %v386_v21  ;;  %v388_v27 = vld [vmem:[%s1603_s2 + $0x50] sm:$0xff] (!%p303_p2)  ;;  %v389_v28 = vld [vmem:[%s1603_s2 + $0x58] sm:$0xff] (!%p303_p2)  ;;  %v1217_v29 = vpack.c.bf16 (!%p303_p2), %v497_v25, %v496_v24  ;;  %v390_v31 = vld [vmem:[%s1603_s2 + $0x60] sm:$0xff] (!%p303_p2) }
   0xc   : > { %1210 = vmatprep.subr.bf16.mxu1 (!%p303_p2), %v1209_v17  ;;  %v1193_v30 = vpack.c.bf16 (!%p303_p2), %v389_v28, %v388_v27  ;;  %v391_v32 = vld [vmem:[%s1603_s2 + $0x68] sm:$0xff] (!%p303_p2)  ;;  %v392_v34 = vld [vmem:[%s1603_s2 + $0x70] sm:$0xff] (!%p303_p2)  ;;  %v393_v35 = vld [vmem:[%s1603_s2 + $0x78] sm:$0xff] (!%p303_p2) }
   0xd   : > { %s1612_s17 = smov (!%p350_p3, %s1003_s17), 7  ;;  %1180 = vmatpush3.bf16.msra.mxu0 %v1177_v5  ;;  %v1197_v33 = vpack.c.bf16 %v391_v32, %v390_v31  ;;  %v1201_v36 = vpack.c.bf16 %v393_v35, %v392_v34  ;;  %v498_v40 = vld [vmem:[%s1605_s4 + $0x40] sm:$0xff]  ;;  %v499_v41 = vld [vmem:[%s1605_s4 + $0x48] sm:$0xff]  ;;  %v500_v43 = vld [vmem:[%s1605_s4 + $0x50] sm:$0xff] }
   0xe   : > { %s1388_s26 = sshll.u32 %s1612_s17, 3  ;;  %1182 = vmatprep.subr.bf16.mxu0 %v1181_v8  ;;  %v1221_v42 = vpack.c.bf16 %v499_v41, %v498_v40  ;;  %v501_v44 = vld [vmem:[%s1605_s4 + $0x58] sm:$0xff]  ;;  %v502_v46 = vld [vmem:[%s1605_s4 + $0x60] sm:$0xff]  ;;  %v503_v47 = vld [vmem:[%s1605_s4 + $0x68] sm:$0xff]  ;;  %s1269_s16 = smul.u32 24, %s1612_s17 }
   0xf   : > { %s1403_s15 = scalar_lea.vmem %s1601_s0, %s1388_s26  ;;  %1212 = vmatpush3.bf16.msra.mxu1 %v1209_v17  ;;  %v1225_v45 = vpack.c.bf16 %v501_v44, %v500_v43  ;;  %v1229_v48 = vpack.c.bf16 %v503_v47, %v502_v46  ;;  %v504_v49 = vld [vmem:[%s1605_s4 + $0x70] sm:$0xff]  ;;  %v505_v50 = vld [vmem:[%s1605_s4 + $0x78] sm:$0xff]  ;;  %s359_s29 = scalar_lea.vmem %s1602_s1, %s1388_s26  ;;  %v1011_v56 = vld [vmem:[%s1604_s3] ss:$0 sm:$0xff] }
  0x10   : > { %v374_v16 = vld [vmem:[%s1403_s15] sm:$0xff]  ;;  %1214 = vmatprep.subr.bf16.mxu1 %v1213_v23  ;;  %v375_v37 = vld [vmem:[%s1403_s15 + $0x8] sm:$0xff]  ;;  %v376_v38 = vld [vmem:[%s1403_s15 + $0x10] sm:$0xff]  ;;  %v1233_v51 = vpack.c.bf16 %v505_v50, %v504_v49  ;;  %s365_s24 = scalar_lea.vmem %s1609_s8, %s1388_s26  ;;  %s1584_s19 = scalar_lea.vmem %s1610_s9, %s1269_s16 }
  0x11   : > { %1107 = vmatprep.mubr.f32.mxu0 %v374_v16  ;;  %1184 = vmatpush3.bf16.msra.mxu0 %v1181_v8  ;;  %v377_v39 = vld [vmem:[%s1403_s15 + $0x18] sm:$0xff]  ;;  %v610_v52 = vld [vmem:[%s359_s29] sm:$0xff]  ;;  %v612_v53 = vld [vmem:[%s359_s29 + $0x10] sm:$0xff] }
  0x12   : > { %1186 = vmatprep.subr.bf16.mxu0 %v1185_v20  ;;  %618 = vrot.lane.b32.xlu0 %v610_v52, %s1304_s10  ;;  %v611_v54 = vld [vmem:[%s359_s29 + $0x8] sm:$0xff]  ;;  %v613_v55 = vld [vmem:[%s359_s29 + $0x18] sm:$0xff]  ;;  %v658_v6 = vld [vmem:[%s1607_s6 + $0x20] sm:$0xff] }
  0x13   : > { %1216 = vmatpush3.bf16.msra.mxu1 %v1213_v23  ;;  %622 = vrot.lane.b32.xlu1 %v612_v53, %s1304_s10  ;;  %v655_v5 = vld [vmem:[%s1607_s6 + $0x8] sm:$0xff]  ;;  %v654_v7 = vld [vmem:[%s1607_s6] sm:$0xff]  ;;  %v657_v9 = vld [vmem:[%s1607_s6 + $0x18] sm:$0xff] }
  0x14   : > { %1218 = vmatprep.subr.bf16.mxu1 %v1217_v29  ;;  %v1237_v8 = vpack.c.bf16 %v658_v6, %v655_v5  ;;  %v656_v10 = vld [vmem:[%s1607_s6 + $0x10] sm:$0xff]  ;;  %v659_v11 = vld [vmem:[%s1607_s6 + $0x28] sm:$0xff]  ;;  %v1239_v12 = vpack.c.bf16 %v657_v9, %v654_v7  ;;  %v661_v14 = vld [vmem:[%s1607_s6 + $0x38] sm:$0xff] }
  0x15   : > { %1188 = vmatpush3.bf16.msra.mxu0 %v1185_v20  ;;  %v1253_v13 = vpack.c.bf16 %v659_v11, %v656_v10  ;;  %v664_v15 = vld [vmem:[%s1607_s6 + $0x50] sm:$0xff]  ;;  %v663_v18 = vld [vmem:[%s1607_s6 + $0x48] sm:$0xff]  ;;  %v662_v19 = vld [vmem:[%s1607_s6 + $0x40] sm:$0xff]  ;;  %v680_v11 = vlaneseq }
  0x16   : > { %1190 = vmatprep.subr.bf16.mxu0 %v1189_v26  ;;  %620 = vrot.lane.b32.xlu0 %v611_v54, %s1304_s10  ;;  %v660_v16 = vld [vmem:[%s1607_s6 + $0x30] sm:$0xff]  ;;  %v1241_v17 = vpack.c.bf16 %v664_v15, %v661_v14  ;;  %v665_v20 = vld [vmem:[%s1607_s6 + $0x58] sm:$0xff]  ;;  %v667_v23 = vld [vmem:[%s1607_s6 + $0x68] sm:$0xff]  ;;  %v1305_v54 = vmov 0.0  }
  0x17   : > { %1220 = vmatpush3.bf16.msra.mxu1 %v1217_v29  ;;  %624 = vrot.lane.b32.xlu1 %v613_v55, %s1304_s10  ;;  %v1243_v21 = vpack.c.bf16 %v663_v18, %v660_v16  ;;  %v1257_v22 = vpack.c.bf16 %v665_v20, %v662_v19  ;;  %v670_v24 = vld [vmem:[%s1607_s6 + $0x80] sm:$0xff]  ;;  %v669_v27 = vld [vmem:[%s1607_s6 + $0x78] sm:$0xff]  ;;  %v668_v28 = vld [vmem:[%s1607_s6 + $0x70] sm:$0xff] }
  0x18   : > { %1222 = vmatprep.subr.bf16.mxu1 %v1221_v42  ;;  %v666_v25 = vld [vmem:[%s1607_s6 + $0x60] sm:$0xff]  ;;  %v671_v29 = vld [vmem:[%s1607_s6 + $0x88] sm:$0xff]  ;;  %v673_v31 = vld [vmem:[%s1607_s6 + $0x98] sm:$0xff] }
  0x19   : > { %1192 = vmatpush3.bf16.msra.mxu0 %v1189_v26  ;;  %v1245_v26 = vpack.c.bf16 %v670_v24, %v667_v23  ;;  %v676_v32 = vld [vmem:[%s1607_s6 + $0xb0] sm:$0xff]  ;;  %v1012_v35 = vld [vmem:[%s1606_s5] ss:$0 sm:$0xff]  ;;  %v675_v41 = vld [vmem:[%s1607_s6 + $0xa8] sm:$0xff] }
  0x1a   : > { %1194 = vmatprep.subr.bf16.mxu0 %v1193_v30  ;;  %v1249_v34 = vpack.c.bf16 %v676_v32, %v673_v31  ;;  %v672_v40 = vld [vmem:[%s1607_s6 + $0x90] sm:$0xff]  ;;  %v678_v14 = vld [vmem:[%s1608_s7] sm:$0x7] }
  0x1b   : > { %1224 = vmatpush3.bf16.msra.mxu1 %v1221_v42  ;;  %v674_v42 = vld [vmem:[%s1607_s6 + $0xa0] sm:$0xff]  ;;  %v1251_v44 = vpack.c.bf16 %v675_v41, %v672_v40 }
  0x1c   : > { %1226 = vmatprep.subr.bf16.mxu1 %v1225_v45 }
  0x1d   : > { %1196 = vmatpush3.bf16.msra.mxu0 %v1193_v30  ;;  %v1261_v30 = vpack.c.bf16 %v671_v29, %v668_v28 }
  0x1e   : > { %1198 = vmatprep.subr.bf16.mxu0 %v1197_v33 }
  0x1f   : > { %1228 = vmatpush3.bf16.msra.mxu1 %v1225_v45  ;;  %v677_v45 = vld [vmem:[%s1607_s6 + $0xb8] sm:$0xff] }
  0x20   : > { %1230 = vmatprep.subr.bf16.mxu1 %v1229_v48 }
  0x21   : > { %1200 = vmatpush3.bf16.msra.mxu0 %v1197_v33  ;;  %v1247_v33 = vpack.c.bf16 %v669_v27, %v666_v25 }
  0x22   : > { %1202 = vmatprep.subr.bf16.mxu0 %v1201_v36 }
  0x23   : > { %1232 = vmatpush3.bf16.msra.mxu1 %v1229_v48  ;;  %v1265_v48 = vpack.c.bf16 %v677_v45, %v674_v42 }
  0x24   : > { %1234 = vmatprep.subr.bf16.mxu1 %v1233_v51 }
  0x25   : > { %1204 = vmatpush3.bf16.msra.mxu0 %v1201_v36 }
  0x26   : > { %1238 = vmatprep.subr.bf16.mxu0 %v1237_v8 }
  0x27   : > { %1236 = vmatpush3.bf16.msra.mxu1 %v1233_v51 }
  0x28   : > { %1108 = vmatmul.mubr.f32.vlgmr.msra.gmra.mrb[0].mxu0 %v375_v37  ;;  %1254 = vmatprep.subr.bf16.mxu1 %v1253_v13 }
  0x29   : > { %1110 = vmatprep.mubr.f32.mxu0 %v376_v38  ;;  %1240 = vmatpush1.bf16.msra.mxu0 %v1239_v12  ;;  %v681_v12 = vshrl.u32 %v680_v11, 7 }
  0x2a   : > { %1242 = vmatprep.subr.bf16.mxu0 %v1241_v17 }
  0x2b   : > { %v686_v15 = vsub.s32 1, %v681_v12  ;;  %v690_v16 = vsub.s32 2, %v681_v12 }
  0x2c   : > { %1111 = vmatmul.mubr.f32.gmra.mrb[2].mxu0 %v377_v39 }
  0x2d   : > { %1244 = vmatpush1.bf16.msra.mxu0 %v1243_v21  ;;  %772 = vmatprep.mubr.f32.mxu0 %v1305_v54  ;;  %v687_v18 = vrot.slane %v678_v14, %v686_v15  ;;  %v691_v19 = vrot.slane %v678_v14, %v690_v16 }
  0x2e   : > { %1246 = vmatprep.subr.bf16.mxu0 %v1245_v26 }
  0x31   : > { %1248 = vmatpush1.bf16.msra.mxu0 %v1247_v33 }
  0x32   : > { %1250 = vmatprep.subr.bf16.mxu0 %v1249_v34 }
  0x35   : > { %1252 = vmatpush1.bf16.msra.mxu0 %v1251_v44 }
  0x84   : > { %v619_v53 = vpop.permute.xlu0 %618 }
  0xfb   : > { %v1109_v57 = vpop.f32.mrb[0].mxu0 }
  0xfc   : > { %v473_v58 = vadd.f32 %v1109_v57, %v1011_v56  ;;  %v467_v59 = vpop.f32.mrb[1].mxu0  ;;  %v621_v57 = vpop.permute.xlu0 %620 }
  0xfd   : > { %v468_v60 = vadd.f32 %v1011_v56, %v467_v59 }
  0xff   : > { %1280 = vtanh.f32 %v468_v60  ;;  %v1112_v61 = vpop.f32.mrb[2].mxu0 }
 0x100   : > { %1282 = vtanh.f32 %v473_v58  ;;  %v483_v62 = vadd.f32 %v1112_v61, %v1011_v56  ;;  %v477_v63 = vpop.f32.mrb[3].mxu0 }
 0x101   : > { %v478_v0 = vadd.f32 %v1011_v56, %v477_v63  ;;  %v623_v56 = vpop.permute.xlu1 %622 }
 0x102   : > { %1284 = vtanh.f32 %v483_v62 }
 0x103   : > { %1286 = vtanh.f32 %v478_v0 }
 0x105   : > { %v625_v62 = vpop.permute.xlu1 %624 }
 0x109   : > { %v1281_v1 = vpop.eup %1280 }
 0x10a   : > { %v1283_v2 = vpop.eup %1282  ;;  %1145 = vmatprep.mubr.f32.mxu1 %v1281_v1 }
 0x10b   : > { %1146 = vmatmul.mubr.f32.vlgmr.msra.gmra.mrb[0].mxu1 %v1283_v2 }
 0x10c   : > { %v1285_v3 = vpop.eup %1284  ;;  %1256 = vmatpush3.bf16.msra.mxu1 %v1253_v13  ;;  %v682_v13 = vsub.s32 0, %v681_v12 }
 0x10d   : > { %v1287_v4 = vpop.eup %1286  ;;  %1258 = vmatprep.subr.bf16.mxu1 %v1257_v22 }
 0x10e   : > { %1148 = vmatprep.mubr.f32.mxu1 %v1287_v4  ;;  %v683_v17 = vrot.slane %v678_v14, %v682_v13 }
 0x10f   : > { %1149 = vmatmul.mubr.f32.gmra.mrb[2].mxu1 %v1285_v3 }
 0x110   : > { %1260 = vmatpush3.bf16.msra.mxu1 %v1257_v22 }
 0x111   : > { %1262 = vmatprep.subr.bf16.mxu1 %v1261_v30 }
 0x114   : > { %1264 = vmatpush3.bf16.msra.mxu1 %v1261_v30 }
 0x115   : > { %1266 = vmatprep.subr.bf16.mxu1 %v1265_v48 }
 0x118   : > { %1268 = vmatpush3.bf16.msra.mxu1 %v1265_v48 }
 0x1de   : > { %v1147_v36 = vpop.f32.mrb[0].mxu1 }
 0x1df   : > { %v585_v37 = vadd.f32 %v1147_v36, %v1012_v35  ;;  %v579_v38 = vpop.f32.mrb[1].mxu1 }
 0x1e0   : > { %v580_v39 = vadd.f32 %v1012_v35, %v579_v38 }
 0x1e1   : > { %v604_v43 = vmul.f32 1.442695, %v585_v37  ;;  %599 = vst [vmem:[%s365_s24 + $0x8] sm:$0xff] %v585_v37 }
 0x1e2   : > { %598 = vst [vmem:[%s365_s24] sm:$0xff] %v580_v39  ;;  %v602_v46 = vmul.f32 1.442695, %v580_v39  ;;  %v1150_v47 = vpop.f32.mrb[2].mxu1 }
 0x1e3   : > { %1288 = vpow2.f32 %v604_v43  ;;  %v595_v49 = vadd.f32 %v1150_v47, %v1012_v35  ;;  %v589_v50 = vpop.f32.mrb[3].mxu1 }
 0x1e4   : > { %1290 = vpow2.f32 %v602_v46  ;;  %v590_v51 = vadd.f32 %v1012_v35, %v589_v50 }
 0x1e5   : > { %v608_v52 = vmul.f32 1.442695, %v595_v49  ;;  %601 = vst [vmem:[%s365_s24 + $0x18] sm:$0xff] %v595_v49 }
 0x1e6   : > { %600 = vst [vmem:[%s365_s24 + $0x10] sm:$0xff] %v590_v51  ;;  %v606_v55 = vmul.f32 1.442695, %v590_v51 }
 0x1e7   : > { %1292 = vpow2.f32 %v608_v52 }
 0x1e8   : > { %1294 = vpow2.f32 %v606_v55 }
 0x1ed   : > { %v1289_v58 = vpop.eup %1288 }
 0x1ee   : > { %v1291_v59 = vpop.eup %1290  ;;  %v631_v60 = vmul.f32 %v1289_v58, %v621_v57 }
 0x1ef   : > { %v630_v61 = vmul.f32 %v1291_v59, %v619_v53 }
 0x1f0   : > { %640 = vrot.lane.b32.xlu1 %v631_v60, %s1304_s10 }
 0x1f1   : > { %v1293_v63 = vpop.eup %1292  ;;  %638 = vrot.lane.b32.xlu0 %v630_v61, %s1304_s10 }
 0x1f2   : > { %v1295_v0 = vpop.eup %1294  ;;  %v633_v1 = vmul.f32 %v1293_v63, %v625_v62 }
 0x1f3   : > { %v632_v2 = vmul.f32 %v1295_v0, %v623_v56 }
 0x1f4   : > { %644 = vrot.lane.b32.xlu1 %v633_v1, %s1304_s10 }
 0x1f5   : > { %642 = vrot.lane.b32.xlu0 %v632_v2, %s1304_s10 }
 0x262   : > { %v641_v3 = vpop.permute.xlu1 %640 }
 0x263   : > { %v639_v4 = vpop.permute.xlu0 %638  ;;  %v651_v6 = vadd.f32 %v641_v3, %v585_v37 }
 0x264   : > { %v650_v5 = vadd.f32 %v639_v4, %v580_v39 }
 0x266   : > { %v645_v7 = vpop.permute.xlu1 %644  ;;  %1013 = vmatmul.mubr.msk.f32.vlgmr.msra.gmra.mrb[4].mxu0 %vm695_vm0, %v650_v5  ;;  %1167 = vmatprep.mubr.msk.f32.mxu1 %vm695_vm0, %v650_v5 }
 0x267   : > { %1168 = vmatmul.mubr.msk.f32.vlgmr.msra.gmra.mrb[4].mxu1 %vm695_vm0, %v651_v6  ;;  %v643_v8 = vpop.permute.xlu0 %642  ;;  %778 = vmatprep.mubr.f32.mxu0 %v1305_v54  ;;  %v653_v10 = vadd.f32 %v645_v7, %v595_v49 }
 0x268   : > { %v652_v9 = vadd.f32 %v643_v8, %v590_v51 }
 0x26a   : > { %1014 = vmatmul.mubr.msk.f32.gmra.mrb[6].mxu0 %vm695_vm0, %v651_v6  ;;  %1170 = vmatprep.mubr.msk.f32.mxu1 %vm695_vm0, %v652_v9 }
 0x26b   : > { %1171 = vmatmul.mubr.msk.f32.gmra.mrb[6].mxu1 %vm695_vm0, %v653_v10  ;;  %784 = vmatprep.mubr.f32.mxu0 %v1305_v54 }
 0x26e   : > { %1015 = vmatmul.mubr.msk.f32.gmra.mrb[8].mxu0 %vm695_vm0, %v652_v9 }
 0x26f   : > { %790 = vmatprep.mubr.f32.mxu0 %v1305_v54 }
 0x272   : > { %1016 = vmatmul.mubr.msk.f32.gmra.mrb[10].mxu0 %vm695_vm0, %v653_v10 }
 0x339   : > { %v774_v20 = vpop.f32.mrb[4].mxu0 }
 0x33a   : > { %v775_v21 = vadd.f32 %v774_v20, %v683_v17  ;;  %v776_v22 = vpop.f32.mrb[5].mxu0  ;;  %v1169_v23 = vpop.f32.mrb[4].mxu1 }
 0x33b   : > { %v777_v24 = vadd.f32 %v776_v22, %v687_v18  ;;  %v863_v25 = vpop.f32.mrb[5].mxu1  ;;  %v869_v27 = vadd.f32 %v1169_v23, %v691_v19 }
 0x33c   : > { %882 = vst [vmem:[%s1584_s19] sm:$0xff] %v775_v21  ;;  %v864_v26 = vadd.f32 %v863_v25, %v691_v19 }
 0x33d   : > { %883 = vst [vmem:[%s1584_s19 + $0x8] sm:$0xff] %v777_v24  ;;  %v780_v28 = vpop.f32.mrb[6].mxu0  ;;  %887 = vst [vmem:[%s1584_s19 + $0x28] sm:$0xff] %v869_v27 }
 0x33e   : > { %884 = vst [vmem:[%s1584_s19 + $0x10] sm:$0xff] %v864_v26  ;;  %v781_v29 = vadd.f32 %v780_v28, %v683_v17  ;;  %v782_v30 = vpop.f32.mrb[7].mxu0  ;;  %v1172_v31 = vpop.f32.mrb[6].mxu1 }
 0x33f   : > { %v783_v32 = vadd.f32 %v782_v30, %v687_v18  ;;  %v873_v33 = vpop.f32.mrb[7].mxu1  ;;  %v879_v35 = vadd.f32 %v1172_v31, %v691_v19 }
 0x340   : > { %885 = vst [vmem:[%s1584_s19 + $0x18] sm:$0xff] %v781_v29  ;;  %v874_v34 = vadd.f32 %v873_v33, %v691_v19 }
 0x341   : > { %886 = vst [vmem:[%s1584_s19 + $0x20] sm:$0xff] %v783_v32  ;;  %v786_v36 = vpop.f32.mrb[8].mxu0  ;;  %893 = vst [vmem:[%s1584_s19 + $0x58] sm:$0xff] %v879_v35 }
 0x342   : > { %890 = vst [vmem:[%s1584_s19 + $0x40] sm:$0xff] %v874_v34  ;;  %v787_v37 = vadd.f32 %v786_v36, %v683_v17  ;;  %v788_v38 = vpop.f32.mrb[9].mxu0 }
 0x343   : > { %v789_v39 = vadd.f32 %v788_v38, %v687_v18 }
 0x344   : > { %888 = vst [vmem:[%s1584_s19 + $0x30] sm:$0xff] %v787_v37 }
 0x345   : > { %889 = vst [vmem:[%s1584_s19 + $0x38] sm:$0xff] %v789_v39  ;;  %v792_v40 = vpop.f32.mrb[10].mxu0 }
 0x346   : > { %v793_v41 = vadd.f32 %v792_v40, %v683_v17  ;;  %v794_v42 = vpop.f32.mrb[11].mxu0 }
 0x347   : > { %v795_v43 = vadd.f32 %v794_v42, %v687_v18 }
 0x348   : > { %891 = vst [vmem:[%s1584_s19 + $0x48] sm:$0xff] %v793_v41 }
 0x349   : > { %892 = vst [vmem:[%s1584_s19 + $0x50] sm:$0xff] %v795_v43 }
 0x34a PF: > { %s20_s30 = sadd.s32 1, %s1302_s30  }
 0x34b   : > { %p17_p4 = scmp.ge.s32.totalorder %s20_s30, 4  }
 0x34d   :  { %19 = sbr.rel (!%p17_p4) target bundleno = 1 (0x1), region = 97 }

// kernel: model_mld_forward.5
= control target key start
LH: loop header
LB: loop body
LE: loop exit
PB: predicated region body
PF: predicated region fallthrough
CT: control target
= control target key end

     0   :  { %s562_s12 = smov 0   ;;  %s644_s0 = inlined_call_operand.vmem [shape: f32[64,32], index: 0, kind: input, shape index: {}]   ;;  %s645_s1 = inlined_call_operand.vmem [shape: f32[32,384], index: 1, kind: input, shape index: {}]   ;;  %s646_s2 = inlined_call_operand.vmem [shape: f32[1,384], index: 2, kind: input, shape index: {}]   ;;  %s647_s3 = inlined_call_operand.vmem [shape: f32[64,384], index: 3, kind: output, shape index: {}]  }
   0x1 LB: > { %s466_s13 = sadd.s32 4294967295, %s539_s12   ;;  %p470_p0 = scmp.ge.s32.totalorder %s539_s12, 1  ;;  %s539_s12 = sphi %s562_s12, %s13_s12  }
   0x2   : > { %p138_p1 = scmp.lt.s32.totalorder %s539_s12, 3 }
   0x4   : > { %p139_p2 = pnand %p470_p0, %p138_p1 }
   0x5   : > { %v181_v0 = vld [vmem:[%s645_s1 + $0x8] sm:$0xff] (!%p139_p2)  ;;  %v184_v1 = vld [vmem:[%s645_s1 + $0x20] sm:$0xff] (!%p139_p2)  ;;  %s471_s20 = sshll.u32 (!%p139_p2), %s466_s13, 2  ;;  %v183_v4 = vld [vmem:[%s645_s1 + $0x18] sm:$0xff] (!%p139_p2)  ;;  %v541_v7 = vmov (!%p139_p2), 0.0   ;;  %vm209_vm0 = vcmask (!%p139_p2), 261120   ;;  %v194_v23 = vlaneseq (!%p139_p2) }
   0x6   : > { %142 = sbr.rel (%p139_p2) target bundleno = 245 (0xf5), region = 32  ;;  %v180_v2 = vld [vmem:[%s645_s1] sm:$0xff] (!%p139_p2)  ;;  %v507_v3 = vpack.c.bf16 (!%p139_p2), %v184_v1, %v181_v0  ;;  %v187_v5 = vld [vmem:[%s645_s1 + $0x38] sm:$0xff] (!%p139_p2)  ;;  %v190_v6 = vld [vmem:[%s645_s1 + $0x50] sm:$0xff] (!%p139_p2)  ;;  %286 = vmatprep.mubr.f32.mxu0 (!%p139_p2), %v541_v7  ;;  %p164_p3 = scmp.lt.s32.totalorder (!%p139_p2), %s471_s20, 7 }
   0x7   : > { %v509_v8 = vpack.c.bf16 (!%p139_p2), %v183_v4, %v180_v2  ;;  %v511_v9 = vpack.c.bf16 (!%p139_p2), %v190_v6, %v187_v5  ;;  %v186_v10 = vld [vmem:[%s645_s1 + $0x30] sm:$0xff] (!%p139_p2)  ;;  %v189_v11 = vld [vmem:[%s645_s1 + $0x48] sm:$0xff] (!%p139_p2)  ;;  %v188_v14 = vld [vmem:[%s645_s1 + $0x40] sm:$0xff] (!%p139_p2)  ;;  %v195_v24 = vshrl.u32 (!%p139_p2), %v194_v23, 7 }
   0x8   : > { %v182_v12 = vld [vmem:[%s645_s1 + $0x10] sm:$0xff] (!%p139_p2)  ;;  %508 = vmatprep.subr.bf16.mxu0 (!%p139_p2), %v507_v3  ;;  %v185_v13 = vld [vmem:[%s645_s1 + $0x28] sm:$0xff] (!%p139_p2)  ;;  %v191_v15 = vld [vmem:[%s645_s1 + $0x58] sm:$0xff] (!%p139_p2)  ;;  %v513_v16 = vpack.c.bf16 (!%p139_p2), %v189_v11, %v186_v10 }
   0x9   : > { %510 = vmatpush1.bf16.msra.mxu0 (!%p139_p2), %v509_v8  ;;  %v515_v17 = vpack.c.bf16 (!%p139_p2), %v185_v13, %v182_v12  ;;  %v519_v18 = vpack.c.bf16 (!%p139_p2), %v191_v15, %v188_v14  ;;  %v196_v25 = vsub.s32 (!%p139_p2), 0, %v195_v24  ;;  %v192_v26 = vld [vmem:[%s646_s2] sm:$0x7] (!%p139_p2)  ;;  %v200_v27 = vsub.s32 (!%p139_p2), 1, %v195_v24 }
   0xa   : > { %512 = vmatprep.subr.bf16.mxu0 (!%p139_p2), %v511_v9  ;;  %v204_v28 = vsub.s32 (!%p139_p2), 2, %v195_v24 }
   0xb   : > { %516 = vmatprep.subr.bf16.mxu1 (!%p139_p2), %v515_v17  ;;  %v197_v29 = vrot.slane (!%p139_p2), %v192_v26, %v196_v25  ;;  %v201_v30 = vrot.slane (!%p139_p2), %v192_v26, %v200_v27 }
   0xc   : > { %518 = vmatpush3.bf16.msra.mxu1 (!%p139_p2), %v515_v17  ;;  %v205_v32 = vrot.slane (!%p139_p2), %v192_v26, %v204_v28 }
   0xd   : > { %s649_s20 = smov (!%p164_p3, %s471_s20), 7  ;;  %514 = vmatpush1.bf16.msra.mxu0 %v513_v16  ;;  %520 = vmatprep.subr.bf16.mxu1 %v519_v18 }
   0xe   : > { %s472_s13 = sshll.u32 %s649_s20, 3  ;;  %s523_s19 = smul.u32 24, %s649_s20 }
   0xf   : > { %s167_s16 = scalar_lea.vmem %s644_s0, %s472_s13 }
  0x10   : > { %v176_v19 = vld [vmem:[%s167_s16] sm:$0xff]  ;;  %522 = vmatpush3.bf16.msra.mxu1 %v519_v18  ;;  %v177_v20 = vld [vmem:[%s167_s16 + $0x8] sm:$0xff]  ;;  %v178_v21 = vld [vmem:[%s167_s16 + $0x10] sm:$0xff]  ;;  %s627_s23 = scalar_lea.vmem %s647_s3, %s523_s19 }
  0x11   : > { %501 = vmatprep.mubr.msk.f32.mxu1 %vm209_vm0, %v176_v19  ;;  %475 = vmatmul.mubr.msk.f32.vlgmr.msra.gmra.mrb[0].mxu0 %vm209_vm0, %v176_v19  ;;  %v179_v22 = vld [vmem:[%s167_s16 + $0x18] sm:$0xff] }
  0x12   : > { %292 = vmatprep.mubr.f32.mxu0 %v541_v7 }
  0x13   : > { %502 = vmatmul.mubr.msk.f32.vlgmr.msra.gmra.mrb[0].mxu1 %vm209_vm0, %v177_v20 }
  0x14   : > { %504 = vmatprep.mubr.msk.f32.mxu1 %vm209_vm0, %v178_v21 }
  0x15   : > { %476 = vmatmul.mubr.msk.f32.gmra.mrb[2].mxu0 %vm209_vm0, %v177_v20 }
  0x16   : > { %298 = vmatprep.mubr.f32.mxu0 %v541_v7 }
  0x17   : > { %505 = vmatmul.mubr.msk.f32.gmra.mrb[2].mxu1 %vm209_vm0, %v179_v22 }
  0x19   : > { %477 = vmatmul.mubr.msk.f32.gmra.mrb[4].mxu0 %vm209_vm0, %v178_v21 }
  0x1a   : > { %304 = vmatprep.mubr.f32.mxu0 %v541_v7 }
  0x1d   : > { %478 = vmatmul.mubr.msk.f32.gmra.mrb[6].mxu0 %vm209_vm0, %v179_v22 }
  0xe4   : > { %v288_v31 = vpop.f32.mrb[0].mxu0 }
  0xe5   : > { %v289_v33 = vadd.f32 %v288_v31, %v197_v29  ;;  %v290_v34 = vpop.f32.mrb[1].mxu0 }
  0xe6   : > { %v291_v35 = vadd.f32 %v290_v34, %v201_v30  ;;  %v503_v36 = vpop.f32.mrb[0].mxu1 }
  0xe7   : > { %396 = vst [vmem:[%s627_s23] sm:$0xff] %v289_v33  ;;  %v383_v38 = vadd.f32 %v503_v36, %v205_v32  ;;  %v377_v39 = vpop.f32.mrb[1].mxu1 }
  0xe8   : > { %397 = vst [vmem:[%s627_s23 + $0x8] sm:$0xff] %v291_v35  ;;  %v294_v37 = vpop.f32.mrb[2].mxu0  ;;  %v378_v42 = vadd.f32 %v377_v39, %v205_v32 }
  0xe9   : > { %v295_v40 = vadd.f32 %v294_v37, %v197_v29  ;;  %v296_v41 = vpop.f32.mrb[3].mxu0  ;;  %401 = vst [vmem:[%s627_s23 + $0x28] sm:$0xff] %v383_v38 }
  0xea   : > { %v297_v43 = vadd.f32 %v296_v41, %v201_v30  ;;  %398 = vst [vmem:[%s627_s23 + $0x10] sm:$0xff] %v378_v42  ;;  %v506_v44 = vpop.f32.mrb[2].mxu1 }
  0xeb   : > { %399 = vst [vmem:[%s627_s23 + $0x18] sm:$0xff] %v295_v40  ;;  %v393_v46 = vadd.f32 %v506_v44, %v205_v32  ;;  %v387_v47 = vpop.f32.mrb[3].mxu1 }
  0xec   : > { %400 = vst [vmem:[%s627_s23 + $0x20] sm:$0xff] %v297_v43  ;;  %v300_v45 = vpop.f32.mrb[4].mxu0  ;;  %v388_v50 = vadd.f32 %v387_v47, %v205_v32 }
  0xed   : > { %v301_v48 = vadd.f32 %v300_v45, %v197_v29  ;;  %v302_v49 = vpop.f32.mrb[5].mxu0  ;;  %407 = vst [vmem:[%s627_s23 + $0x58] sm:$0xff] %v393_v46 }
  0xee   : > { %v303_v51 = vadd.f32 %v302_v49, %v201_v30  ;;  %404 = vst [vmem:[%s627_s23 + $0x40] sm:$0xff] %v388_v50 }
  0xef   : > { %402 = vst [vmem:[%s627_s23 + $0x30] sm:$0xff] %v301_v48 }
  0xf0   : > { %403 = vst [vmem:[%s627_s23 + $0x38] sm:$0xff] %v303_v51  ;;  %v306_v52 = vpop.f32.mrb[6].mxu0 }
  0xf1   : > { %v307_v53 = vadd.f32 %v306_v52, %v197_v29  ;;  %v308_v54 = vpop.f32.mrb[7].mxu0 }
  0xf2   : > { %v309_v55 = vadd.f32 %v308_v54, %v201_v30 }
  0xf3   : > { %405 = vst [vmem:[%s627_s23 + $0x48] sm:$0xff] %v307_v53 }
  0xf4   : > { %406 = vst [vmem:[%s627_s23 + $0x50] sm:$0xff] %v309_v55 }
  0xf5 PF: > { %s13_s12 = sadd.s32 1, %s539_s12  }
  0xf6   : > { %p10_p4 = scmp.ge.s32.totalorder %s13_s12, 4  }
  0xf8   :  { %12 = sbr.rel (!%p10_p4) target bundleno = 1 (0x1), region = 62 }

// kernel: model_mld_forward.9
= control target key start
LH: loop header
LB: loop body
LE: loop exit
PB: predicated region body
PF: predicated region fallthrough
CT: control target
= control target key end

     0   :  { %s869_s18 = smov 0   ;;  %s871_s19 = smov 0   ;;  %s993_s0 = inlined_call_operand.vmem [shape: f32[64,128], index: 0, kind: input, shape index: {}]   ;;  %s994_s1 = inlined_call_operand.vmem [shape: f32[128,128], index: 1, kind: input, shape index: {}]   ;;  %s995_s2 = inlined_call_operand.vmem [shape: f32[1,128], index: 2, kind: input, shape index: {}]   ;;  %s996_s3 = inlined_call_operand.vmem [shape: bf16[128,128], index: 3, kind: input, shape index: {}]   ;;  %s997_s4 = inlined_call_operand.vmem [shape: f32[1,128], index: 4, kind: input, shape index: {}]   ;;  %s998_s5 = inlined_call_operand.vmem [shape: f32[64,128], index: 5, kind: output, shape index: {}]  }
   0x1   :  { %s873_s20 = smov 0  }
   0x2 LB: > { %s27_s21 = sadd.s32 1, %s833_s19  ;;  %p638_p0 = scmp.ge.s32.totalorder %s837_s20, 1  ;;  %s837_s20 = sphi %s873_s20, %s15_s20   ;;  %s833_s19 = sphi %s871_s19, %s1000_s19   ;;  %s829_s18 = sphi %s869_s18, %s999_s18  }
   0x3   : > { %p29_p1 = scmp.ge.s32.totalorder %s27_s21, 2  ;;  %p219_p2 = scmp.lt.s32.totalorder %s837_s20, 3 }
   0x5   : > { %s1002_s21 = smov (%p29_p1, %s27_s21), 0  ;;  %p220_p3 = pnand %p638_p0, %p219_p2 }
   0x6   : > { %v288_v0 = vld [vmem:[%s994_s1] sm:$0xff] (!%p220_p3)  ;;  %v289_v1 = vld [vmem:[%s994_s1 + $0x8] sm:$0xff] (!%p220_p3)  ;;  %v290_v2 = vld [vmem:[%s994_s1 + $0x10] sm:$0xff] (!%p220_p3)  ;;  %s639_s28 = sshll.u32 (!%p220_p3), %s829_s18, 2 }
   0x7   : > { %223 = sbr.rel (%p220_p3) target bundleno = 491 (0x1eb), region = 40  ;;  %v743_v3 = vpack.c.bf16 (!%p220_p3), %v289_v1, %v288_v0  ;;  %v291_v4 = vld [vmem:[%s994_s1 + $0x18] sm:$0xff] (!%p220_p3)  ;;  %p258_p4 = scmp.lt.s32.totalorder (!%p220_p3), %s639_s28, 7  ;;  %v292_v6 = vld [vmem:[%s994_s1 + $0x20] sm:$0xff] (!%p220_p3)  ;;  %v293_v7 = vld [vmem:[%s994_s1 + $0x28] sm:$0xff] (!%p220_p3) }
   0x8   : > { %v747_v5 = vpack.c.bf16 (!%p220_p3), %v291_v4, %v290_v2  ;;  %v294_v8 = vld [vmem:[%s994_s1 + $0x30] sm:$0xff] (!%p220_p3)  ;;  %v751_v9 = vpack.c.bf16 (!%p220_p3), %v293_v7, %v292_v6  ;;  %v295_v10 = vld [vmem:[%s994_s1 + $0x38] sm:$0xff] (!%p220_p3)  ;;  %v799_v11 = vld [vmem:[%s996_s3] sm:$0xff] (!%p220_p3)  }
   0x9   : > { %744 = vmatprep.subr.bf16.mxu0 (!%p220_p3), %v743_v3  ;;  %v296_v13 = vld [vmem:[%s994_s1 + $0x40] sm:$0xff] (!%p220_p3)  ;;  %v297_v14 = vld [vmem:[%s994_s1 + $0x48] sm:$0xff] (!%p220_p3)  ;;  %v755_v16 = vpack.c.bf16 (!%p220_p3), %v295_v10, %v294_v8  ;;  %723 = vmatprep.subr.bf16.mxu1 (!%p220_p3), %v799_v11  ;;  %v801_v17 = vld [vmem:[%s996_s3 + $0x10] sm:$0xff] (!%p220_p3)  }
   0xa   : > { %746 = vmatpush3.bf16.msra.mxu0 (!%p220_p3), %v743_v3  ;;  %v800_v15 = vld [vmem:[%s996_s3 + $0x8] sm:$0xff] (!%p220_p3)   ;;  %724 = vmatpush3.bf16.msra.mxu1 (!%p220_p3), %v799_v11  ;;  %v759_v18 = vpack.c.bf16 (!%p220_p3), %v297_v14, %v296_v13  ;;  %v298_v19 = vld [vmem:[%s994_s1 + $0x50] sm:$0xff] (!%p220_p3)  ;;  %v299_v20 = vld [vmem:[%s994_s1 + $0x58] sm:$0xff] (!%p220_p3) }
   0xb   : > { %748 = vmatprep.subr.bf16.mxu0 (!%p220_p3), %v747_v5  ;;  %725 = vmatprep.subr.bf16.mxu1 (!%p220_p3), %v800_v15  ;;  %v763_v21 = vpack.c.bf16 (!%p220_p3), %v299_v20, %v298_v19  ;;  %v300_v22 = vld [vmem:[%s994_s1 + $0x60] sm:$0xff] (!%p220_p3)  ;;  %v301_v23 = vld [vmem:[%s994_s1 + $0x68] sm:$0xff] (!%p220_p3)  ;;  %v302_v25 = vld [vmem:[%s994_s1 + $0x70] sm:$0xff] (!%p220_p3) }
   0xc   : > { %v767_v24 = vpack.c.bf16 (!%p220_p3), %v301_v23, %v300_v22  ;;  %v303_v26 = vld [vmem:[%s994_s1 + $0x78] sm:$0xff] (!%p220_p3)  ;;  %v803_v32 = vld [vmem:[%s996_s3 + $0x20] sm:$0xff] (!%p220_p3)   ;;  %v804_v33 = vld [vmem:[%s996_s3 + $0x28] sm:$0xff] (!%p220_p3)  }
   0xd   : > { %v771_v27 = vpack.c.bf16 (!%p220_p3), %v303_v26, %v302_v25  ;;  %v802_v31 = vld [vmem:[%s996_s3 + $0x18] sm:$0xff] (!%p220_p3)   ;;  %v805_v34 = vld [vmem:[%s996_s3 + $0x30] sm:$0xff] (!%p220_p3)   ;;  %v643_v36 = vld [vmem:[%s995_s2] ss:$0 sm:$0xff] (!%p220_p3) }
   0xe   : > { %s1004_s28 = smov (!%p258_p4, %s639_s28), 7  ;;  %750 = vmatpush3.bf16.msra.mxu0 %v747_v5  ;;  %726 = vmatpush3.bf16.msra.mxu1 %v800_v15  ;;  %v806_v35 = vld [vmem:[%s996_s3 + $0x38] sm:$0xff]   ;;  %v644_v51 = vld [vmem:[%s997_s4] ss:$0 sm:$0xff] }
   0xf   : > { %s640_s14 = sshll.u32 %s1004_s28, 3  ;;  %752 = vmatprep.subr.bf16.mxu0 %v751_v9  ;;  %727 = vmatprep.subr.bf16.mxu1 %v801_v17 }
  0x10   : > { %s919_s17 = scalar_lea.vmem %s993_s0, %s640_s14  ;;  %s277_s16 = scalar_lea.vmem %s998_s5, %s640_s14 }
  0x11   : > { %v284_v12 = vld [vmem:[%s919_s17] sm:$0xff]  ;;  %v285_v28 = vld [vmem:[%s919_s17 + $0x8] sm:$0xff]  ;;  %v286_v29 = vld [vmem:[%s919_s17 + $0x10] sm:$0xff] }
  0x12   : > { %717 = vmatprep.mubr.f32.mxu0 %v284_v12  ;;  %754 = vmatpush3.bf16.msra.mxu0 %v751_v9  ;;  %v287_v30 = vld [vmem:[%s919_s17 + $0x18] sm:$0xff] }
  0x13   : > { %756 = vmatprep.subr.bf16.mxu0 %v755_v16  ;;  %728 = vmatpush3.bf16.msra.mxu1 %v801_v17 }
  0x14   : > { %729 = vmatprep.subr.bf16.mxu1 %v802_v31 }
  0x16   : > { %758 = vmatpush3.bf16.msra.mxu0 %v755_v16 }
  0x17   : > { %760 = vmatprep.subr.bf16.mxu0 %v759_v18  ;;  %730 = vmatpush3.bf16.msra.mxu1 %v802_v31 }
  0x18   : > { %731 = vmatprep.subr.bf16.mxu1 %v803_v32 }
  0x1a   : > { %762 = vmatpush3.bf16.msra.mxu0 %v759_v18 }
  0x1b   : > { %764 = vmatprep.subr.bf16.mxu0 %v763_v21  ;;  %732 = vmatpush3.bf16.msra.mxu1 %v803_v32 }
  0x1c   : > { %733 = vmatprep.subr.bf16.mxu1 %v804_v33 }
  0x1e   : > { %766 = vmatpush3.bf16.msra.mxu0 %v763_v21 }
  0x1f   : > { %768 = vmatprep.subr.bf16.mxu0 %v767_v24  ;;  %734 = vmatpush3.bf16.msra.mxu1 %v804_v33 }
  0x20   : > { %735 = vmatprep.subr.bf16.mxu1 %v805_v34 }
  0x22   : > { %770 = vmatpush3.bf16.msra.mxu0 %v767_v24 }
  0x23   : > { %772 = vmatprep.subr.bf16.mxu0 %v771_v27  ;;  %736 = vmatpush3.bf16.msra.mxu1 %v805_v34 }
  0x24   : > { %737 = vmatprep.subr.bf16.mxu1 %v806_v35 }
  0x26   : > { %774 = vmatpush3.bf16.msra.mxu0 %v771_v27 }
  0x27   : > { %738 = vmatpush3.bf16.msra.mxu1 %v806_v35 }
  0x29   : > { %718 = vmatmul.mubr.f32.vlgmr.msra.gmra.mrb[0].mxu0 %v285_v28 }
  0x2a   : > { %720 = vmatprep.mubr.f32.mxu0 %v286_v29 }
  0x2d   : > { %721 = vmatmul.mubr.f32.gmra.mrb[2].mxu0 %v287_v30 }
  0xfc   : > { %v719_v37 = vpop.f32.mrb[0].mxu0 }
  0xfd   : > { %v383_v38 = vadd.f32 %v719_v37, %v643_v36  ;;  %v377_v39 = vpop.f32.mrb[1].mxu0 }
  0xfe   : > { %v378_v40 = vadd.f32 %v643_v36, %v377_v39 }
  0xff   : > { %807 = vtanh.f32 %v383_v38 }
 0x100   : > { %809 = vtanh.f32 %v378_v40  ;;  %v722_v41 = vpop.f32.mrb[2].mxu0 }
 0x101   : > { %v393_v42 = vadd.f32 %v722_v41, %v643_v36  ;;  %v387_v43 = vpop.f32.mrb[3].mxu0 }
 0x102   : > { %v388_v44 = vadd.f32 %v643_v36, %v387_v43 }
 0x103   : > { %811 = vtanh.f32 %v393_v42 }
 0x104   : > { %813 = vtanh.f32 %v388_v44 }
 0x109   : > { %v808_v45 = vpop.eup %807 }
 0x10a   : > { %v810_v46 = vpop.eup %809 }
 0x10b   : > { %v400_v47 = vpack.c.bf16 %v808_v45, %v810_v46 }
 0x10d   : > { %v812_v48 = vpop.eup %811  ;;  %739 = vmatprep.mubr.bf16.mxu1 %v400_v47 }
 0x10e   : > { %v814_v49 = vpop.eup %813 }
 0x10f   : > { %v401_v50 = vpack.c.bf16 %v812_v48, %v814_v49 }
 0x111   : > { %740 = vmatmul.mubr.bf16.vlgmr.msra.gmra.mrb[0].mxu1 %v401_v50 }
 0x1e4   : > { %v741_v52 = vpop.f32.mrb[0].mxu1 }
 0x1e5   : > { %v511_v53 = vpop.f32.mrb[1].mxu1  ;;  %v520_v58 = vadd.f32 %v741_v52, %v644_v51 }
 0x1e6   : > { %v512_v54 = vadd.f32 %v644_v51, %v511_v53  ;;  %v742_v55 = vpop.f32.mrb[2].mxu1 }
 0x1e7   : > { %v514_v56 = vpop.f32.mrb[3].mxu1  ;;  %v523_v59 = vadd.f32 %v742_v55, %v644_v51  ;;  %528 = vst [vmem:[%s277_s16 + $0x10] sm:$0xff] %v520_v58 }
 0x1e8   : > { %526 = vst [vmem:[%s277_s16] sm:$0xff] %v512_v54  ;;  %v515_v57 = vadd.f32 %v644_v51, %v514_v56 }
 0x1e9   : > { %529 = vst [vmem:[%s277_s16 + $0x18] sm:$0xff] %v523_v59 }
 0x1ea   : > { %527 = vst [vmem:[%s277_s16 + $0x8] sm:$0xff] %v515_v57 }
 0x1eb PF: > { %s15_s20 = sadd.s32 1, %s837_s20   ;;  %s999_s18 = smov %s833_s19 }
 0x1ec   : > { %p12_p5 = scmp.ge.s32.totalorder %s15_s20, 4   ;;  %s1000_s19 = smov %s1002_s21 }
 0x1ee   :  { %14 = sbr.rel (!%p12_p5) target bundleno = 2 (0x2), region = 80 }

// kernel: model_mld_forward.6
= control target key start
LH: loop header
LB: loop body
LE: loop exit
PB: predicated region body
PF: predicated region fallthrough
CT: control target
= control target key end

     0   :  { %v2546_v3 = vmov 0.0|0.0   ;;  %v2547_v4 = vmov 0.0   ;;  %vm2548_vm0 = vmmov 0   ;;  %v2549_v9 = vmov 0   ;;  %s3225_s2 = inlined_call_operand.vmem [shape: f32[128,384], index: 2, kind: input, shape index: {}]   ;;  %s3226_s1 = inlined_call_operand.vmem [shape: f32[64,1], index: 1, kind: input, shape index: {}]   ;;  %s3227_s0 = inlined_call_operand.vmem [shape: f32[64,384], index: 0, kind: input, shape index: {}]   ;;  %s3228_s3 = inlined_call_operand.vmem [shape: f32[1,128], index: 3, kind: input, shape index: {}]   ;;  %s3229_s4 = inlined_call_operand.vmem [shape: f32[64,128], index: 4, kind: output, shape index: {}]  }
   0x1   :  { %v23_v0 = vld [vmem:[%s3225_s2 + $0x8] sm:$0xff]  ;;  %v26_v1 = vld [vmem:[%s3225_s2 + $0x20] sm:$0xff]  ;;  %2044 = vmatprep.subr.bf16.mxu1 %v2546_v3  ;;  %142 = vmatprep.mubr.f32.mxu0 %v2547_v4  ;;  %v25_v6 = vld [vmem:[%s3225_s2 + $0x18] sm:$0xff] }
   0x2   :  { %v22_v2 = vld [vmem:[%s3225_s2] sm:$0xff]  ;;  %v2586_v5 = vpack.c.bf16 %v26_v1, %v23_v0  ;;  %v29_v7 = vld [vmem:[%s3225_s2 + $0x38] sm:$0xff]  ;;  %v32_v8 = vld [vmem:[%s3225_s2 + $0x50] sm:$0xff]  ;;  %1764 = vmatprep.mubr.msk.f32.mxu1 %vm2548_vm0, %v2547_v4  ;;  %2464 = vset.pattern.permute.xlu0 %v2549_v9 }
   0x3   :  { %v2599_v10 = vpack.c.bf16 %v25_v6, %v22_v2  ;;  %v2601_v11 = vpack.c.bf16 %v32_v8, %v29_v7  ;;  %v28_v12 = vld [vmem:[%s3225_s2 + $0x30] sm:$0xff]  ;;  %v31_v13 = vld [vmem:[%s3225_s2 + $0x48] sm:$0xff]  ;;  %2465 = vset.pattern.permute.xlu1 %v2549_v9  ;;  %v38_v15 = vld [vmem:[%s3225_s2 + $0x80] sm:$0xff] }
   0x4   :  { %v35_v14 = vld [vmem:[%s3225_s2 + $0x68] sm:$0xff]  ;;  %2013 = vmatprep.subr.bf16.mxu0 %v2586_v5  ;;  %v2617_v16 = vpack.c.bf16 %v31_v13, %v28_v12  ;;  %v34_v18 = vld [vmem:[%s3225_s2 + $0x60] sm:$0xff]  ;;  %v37_v19 = vld [vmem:[%s3225_s2 + $0x78] sm:$0xff] }
   0x5   :  { %2015 = vmatpush1.bf16.msra.mxu0 %v2599_v10  ;;  %v2620_v17 = vpack.c.bf16 %v38_v15, %v35_v14  ;;  %v41_v20 = vld [vmem:[%s3225_s2 + $0x98] sm:$0xff]  ;;  %v44_v21 = vld [vmem:[%s3225_s2 + $0xb0] sm:$0xff]  ;;  %v2635_v22 = vpack.c.bf16 %v37_v19, %v34_v18  ;;  %v43_v25 = vld [vmem:[%s3225_s2 + $0xa8] sm:$0xff] }
   0x6   :  { %2017 = vmatprep.subr.bf16.mxu0 %v2601_v11  ;;  %v40_v23 = vld [vmem:[%s3225_s2 + $0x90] sm:$0xff]  ;;  %v2641_v24 = vpack.c.bf16 %v44_v21, %v41_v20  ;;  %v27_v27 = vld [vmem:[%s3225_s2 + $0x28] sm:$0xff]  ;;  %v50_v29 = vld [vmem:[%s3225_s2 + $0xe0] sm:$0xff] }
   0x7   :  { %v24_v26 = vld [vmem:[%s3225_s2 + $0x10] sm:$0xff]  ;;  %v47_v28 = vld [vmem:[%s3225_s2 + $0xc8] sm:$0xff]  ;;  %v30_v31 = vld [vmem:[%s3225_s2 + $0x40] sm:$0xff]  ;;  %v2667_v33 = vpack.c.bf16 %v43_v25, %v40_v23 }
   0x8   :  { %v2658_v30 = vpack.c.bf16 %v27_v27, %v24_v26  ;;  %v33_v32 = vld [vmem:[%s3225_s2 + $0x58] sm:$0xff]  ;;  %v46_v34 = vld [vmem:[%s3225_s2 + $0xc0] sm:$0xff]  ;;  %v2676_v36 = vpack.c.bf16 %v50_v29, %v47_v28  ;;  %v36_v38 = vld [vmem:[%s3225_s2 + $0x70] sm:$0xff] }
   0x9   :  { %2019 = vmatpush1.bf16.msra.mxu0 %v2617_v16  ;;  %v2673_v35 = vpack.c.bf16 %v33_v32, %v30_v31  ;;  %v49_v37 = vld [vmem:[%s3225_s2 + $0xd8] sm:$0xff]  ;;  %v39_v39 = vld [vmem:[%s3225_s2 + $0x88] sm:$0xff]  ;;  %v56_v41 = vld [vmem:[%s3225_s2 + $0x110] sm:$0xff] }
   0xa   :  { %2021 = vmatprep.subr.bf16.mxu0 %v2620_v17  ;;  %2046 = vmatpush3.bf16.msra.mxu1 %v2658_v30  ;;  %v53_v40 = vld [vmem:[%s3225_s2 + $0xf8] sm:$0xff]  ;;  %v2695_v42 = vpack.c.bf16 %v49_v37, %v46_v34  ;;  %v52_v43 = vld [vmem:[%s3225_s2 + $0xf0] sm:$0xff]  ;;  %v2701_v44 = vpack.c.bf16 %v39_v39, %v36_v38  ;;  %v247_v45 = vld [vmem:[%s3226_s1] sm:$0xff] }
   0xb   :  { %2047 = vmatprep.subr.bf16.mxu1 %v2546_v3  ;;  %v2707_v46 = vpack.c.bf16 %v56_v41, %v53_v40  ;;  %v55_v47 = vld [vmem:[%s3225_s2 + $0x108] sm:$0xff]  ;;  %v42_v48 = vld [vmem:[%s3225_s2 + $0xa0] sm:$0xff]  ;;  %v45_v49 = vld [vmem:[%s3225_s2 + $0xb8] sm:$0xff]  ;;  %250 = vperm.xlu0 %2464, %v247_v45  }
   0xc   :  { %v59_v50 = vld [vmem:[%s3225_s2 + $0x128] sm:$0xff]  ;;  %v62_v51 = vld [vmem:[%s3225_s2 + $0x140] sm:$0xff]  ;;  %v2729_v53 = vpack.c.bf16 %v55_v47, %v52_v43  ;;  %v2735_v55 = vpack.c.bf16 %v45_v49, %v42_v48  ;;  %v61_v57 = vld [vmem:[%s3225_s2 + $0x138] sm:$0xff] }
   0xd   :  { %2023 = vmatpush1.bf16.msra.mxu0 %v2635_v22  ;;  %v1552_v52 = vld [vmem:[%s3226_s1 + $0x8] sm:$0xff]  ;;  %v58_v54 = vld [vmem:[%s3225_s2 + $0x120] sm:$0xff]  ;;  %v2738_v56 = vpack.c.bf16 %v62_v51, %v59_v50  ;;  %v48_v58 = vld [vmem:[%s3225_s2 + $0xd0] sm:$0xff] }
   0xe   :  { %2025 = vmatprep.subr.bf16.mxu0 %v2641_v24  ;;  %2049 = vmatpush3.bf16.msra.mxu1 %v2673_v35  ;;  %v51_v59 = vld [vmem:[%s3225_s2 + $0xe8] sm:$0xff]  ;;  %v65_v60 = vld [vmem:[%s3225_s2 + $0x158] sm:$0xff]  ;;  %v68_v61 = vld [vmem:[%s3225_s2 + $0x170] sm:$0xff]  ;;  %v2760_v63 = vpack.c.bf16 %v61_v57, %v58_v54 }
   0xf   :  { %2050 = vmatprep.subr.bf16.mxu1 %v2546_v3  ;;  %431 = vperm.xlu0 %2464, %v1552_v52   ;;  %v1573_v62 = vld [vmem:[%s3226_s1 + $0x20] sm:$0xff]  ;;  %v64_v0 = vld [vmem:[%s3225_s2 + $0x150] sm:$0xff]  ;;  %v2766_v1 = vpack.c.bf16 %v51_v59, %v48_v58  ;;  %v2769_v2 = vpack.c.bf16 %v68_v61, %v65_v60  ;;  %v67_v6 = vld [vmem:[%s3225_s2 + $0x168] sm:$0xff] }
  0x10   :  { %v54_v7 = vld [vmem:[%s3225_s2 + $0x100] sm:$0xff]  ;;  %v57_v8 = vld [vmem:[%s3225_s2 + $0x118] sm:$0xff]  ;;  %v1587_v9 = vld [vmem:[%s3226_s1 + $0x30] sm:$0xff]  ;;  %v2785_v12 = vpack.c.bf16 %v67_v6, %v64_v0 }
  0x11   :  { %2027 = vmatpush1.bf16.msra.mxu0 %v2667_v33  ;;  %v2788_v13 = vpack.c.bf16 %v57_v8, %v54_v7  ;;  %v60_v14 = vld [vmem:[%s3225_s2 + $0x130] sm:$0xff]  ;;  %v63_v15 = vld [vmem:[%s3225_s2 + $0x148] sm:$0xff]  ;;  %v66_v19 = vld [vmem:[%s3225_s2 + $0x160] sm:$0xff] }
  0x12   :  { %2029 = vmatprep.subr.bf16.mxu0 %v2676_v36  ;;  %2052 = vmatpush3.bf16.msra.mxu1 %v2701_v44  ;;  %v2800_v18 = vpack.c.bf16 %v63_v15, %v60_v14  ;;  %v69_v20 = vld [vmem:[%s3225_s2 + $0x178] sm:$0xff]  ;;  %v75_v23 = vld [vmem:[%s3227_s0] sm:$0xff]  ;;  %v76_v27 = vld [vmem:[%s3227_s0 + $0x8] sm:$0xff] }
  0x13   :  { %2053 = vmatprep.subr.bf16.mxu1 %v2546_v3  ;;  %977 = vperm.xlu0 %2464, %v1573_v62   ;;  %v2812_v21 = vpack.c.bf16 %v69_v20, %v66_v19  ;;  %v2862_v41 = vld [vmem:[%s3228_s3] ss:$0 sm:$0xff]  ;;  %v77_v48 = vld [vmem:[%s3227_s0 + $0x10] sm:$0xff]  ;;  %v1566_v0 = vld [vmem:[%s3226_s1 + $0x18] sm:$0xff] }
  0x14   :  { %v1559_v62 = vld [vmem:[%s3226_s1 + $0x10] sm:$0xff]  ;;  %v1580_v6 = vld [vmem:[%s3226_s1 + $0x28] sm:$0xff]  ;;  %v1594_v7 = vld [vmem:[%s3226_s1 + $0x38] sm:$0xff] }
  0x15   :  { %2031 = vmatpush1.bf16.msra.mxu0 %v2695_v42  ;;  %613 = vperm.xlu1 %2465, %v1559_v62   ;;  %v1547_v8 = vld [vmem:[%s3227_s0 + $0x18] sm:$0xff]  ;;  %v1548_v19 = vld [vmem:[%s3227_s0 + $0x20] sm:$0xff] }
  0x16   :  { %2033 = vmatprep.subr.bf16.mxu0 %v2707_v46  ;;  %2055 = vmatpush3.bf16.msra.mxu1 %v2735_v55 }
  0x17   :  { %2056 = vmatprep.subr.bf16.mxu1 %v2546_v3  ;;  %1341 = vperm.xlu0 %2464, %v1587_v9  }
  0x19   :  { %2035 = vmatpush1.bf16.msra.mxu0 %v2729_v53  ;;  %795 = vperm.xlu1 %2465, %v1566_v0   ;;  %v1555_v0 = vld [vmem:[%s3227_s0 + $0x38] sm:$0xff] }
  0x1a   :  { %2037 = vmatprep.subr.bf16.mxu0 %v2738_v56  ;;  %2058 = vmatpush3.bf16.msra.mxu1 %v2766_v1 }
  0x1b   :  { %2059 = vmatprep.subr.bf16.mxu1 %v2546_v3 }
  0x1d   :  { %2039 = vmatpush1.bf16.msra.mxu0 %v2760_v63  ;;  %1159 = vperm.xlu1 %2465, %v1580_v6  }
  0x1e   :  { %2041 = vmatprep.subr.bf16.mxu0 %v2769_v2  ;;  %2061 = vmatpush3.bf16.msra.mxu1 %v2788_v13 }
  0x1f   :  { %2062 = vmatprep.subr.bf16.mxu1 %v2546_v3 }
  0x21   :  { %2043 = vmatpush1.bf16.msra.mxu0 %v2785_v12  ;;  %1523 = vperm.xlu1 %2465, %v1594_v7  }
  0x22   :  { %2069 = vmatprep.subr.bf16.mxu0 %v2586_v5  ;;  %2064 = vmatpush3.bf16.msra.mxu1 %v2800_v18 }
  0x23   :  { %2065 = vmatprep.subr.bf16.mxu1 %v2546_v3 }
  0x24   :  { %143 = vmatmul.mubr.f32.vlgmr.msra.gmra.mrb[0].mxu0 %v2547_v4 }
  0x25   :  { %2071 = vmatpush1.bf16.msra.mxu0 %v2599_v10  ;;  %328 = vmatprep.mubr.f32.mxu0 %v2547_v4 }
  0x26   :  { %2073 = vmatprep.subr.bf16.mxu0 %v2601_v11  ;;  %2067 = vmatpush3.bf16.msra.mxu1 %v2812_v21 }
  0x27   :  { %2100 = vmatprep.subr.bf16.mxu1 %v2546_v3 }
  0x29   :  { %2075 = vmatpush1.bf16.msra.mxu0 %v2617_v16  ;;  %1765 = vmatmul.mubr.f32.vlgmr.msra.gmra.mrb[0].mxu1 %v2547_v4 }
  0x2a   :  { %2077 = vmatprep.subr.bf16.mxu0 %v2620_v17  ;;  %2102 = vmatpush3.bf16.msra.mxu1 %v2658_v30 }
  0x2b   :  { %2103 = vmatprep.subr.bf16.mxu1 %v2546_v3  ;;  %1799 = vmatprep.mubr.msk.f32.mxu1 %vm2548_vm0, %v2547_v4 }
  0x2d   :  { %2079 = vmatpush1.bf16.msra.mxu0 %v2635_v22 }
  0x2e   :  { %2081 = vmatprep.subr.bf16.mxu0 %v2641_v24  ;;  %2105 = vmatpush3.bf16.msra.mxu1 %v2673_v35 }
  0x2f   :  { %2106 = vmatprep.subr.bf16.mxu1 %v2546_v3 }
  0x31   :  { %2083 = vmatpush1.bf16.msra.mxu0 %v2667_v33 }
  0x32   :  { %2085 = vmatprep.subr.bf16.mxu0 %v2676_v36  ;;  %2108 = vmatpush3.bf16.msra.mxu1 %v2701_v44 }
  0x33   :  { %2109 = vmatprep.subr.bf16.mxu1 %v2546_v3 }
  0x35   :  { %2087 = vmatpush1.bf16.msra.mxu0 %v2695_v42 }
  0x36   :  { %2089 = vmatprep.subr.bf16.mxu0 %v2707_v46  ;;  %2111 = vmatpush3.bf16.msra.mxu1 %v2735_v55 }
  0x37   :  { %2112 = vmatprep.subr.bf16.mxu1 %v2546_v3 }
  0x39   :  { %2091 = vmatpush1.bf16.msra.mxu0 %v2729_v53 }
  0x3a   :  { %2093 = vmatprep.subr.bf16.mxu0 %v2738_v56  ;;  %2114 = vmatpush3.bf16.msra.mxu1 %v2766_v1 }
  0x3b   :  { %2115 = vmatprep.subr.bf16.mxu1 %v2546_v3 }
  0x3d   :  { %2095 = vmatpush1.bf16.msra.mxu0 %v2760_v63 }
  0x3e   :  { %2097 = vmatprep.subr.bf16.mxu0 %v2769_v2  ;;  %2117 = vmatpush3.bf16.msra.mxu1 %v2788_v13 }
  0x3f   :  { %2118 = vmatprep.subr.bf16.mxu1 %v2546_v3 }
  0x41   :  { %2099 = vmatpush1.bf16.msra.mxu0 %v2785_v12 }
  0x42   :  { %2125 = vmatprep.subr.bf16.mxu0 %v2586_v5  ;;  %2120 = vmatpush3.bf16.msra.mxu1 %v2800_v18 }
  0x43   :  { %2121 = vmatprep.subr.bf16.mxu1 %v2546_v3 }
  0x46   :  { %2123 = vmatpush3.bf16.msra.mxu1 %v2812_v21 }
  0x47   :  { %2156 = vmatprep.subr.bf16.mxu1 %v2546_v3 }
  0x8a   :  { %v251_v60 = vpop.permute.xlu0 %250 }
  0xf7   :  { %v144_v25 = vpop.f32.mrb[0].mxu0 }
  0xf8   :  { %v219_v26 = vadd.f32 %v144_v25, %v75_v23  ;;  %v146_v28 = vpop.f32.mrb[1].mxu0 }
  0xf9   :  { %v226_v31 = vadd.f32 %v146_v28, %v76_v27 }
  0xfa   :  { %v1544_v29 = vmul.f32 -1.442695, %v219_v26 }
  0xfb   :  { %v1545_v32 = vmul.f32 -1.442695, %v226_v31 }
  0xfc   :  { %2466 = vpow2.f32 %v1544_v29  ;;  %v215_v34 = vpop.f32.mrb[0].mxu1 }
  0xfd   :  { %v1766_v37 = vpop.f32.mrb[1].mxu1  ;;  %2468 = vpow2.f32 %v1545_v32  ;;  %v239_v45 = vadd.f32 %v2862_v41, %v215_v34 }
 0x106   :  { %v2467_v38 = vpop.eup %2466 }
 0x107   :  { %v223_v39 = vadd.f32 1.0, %v2467_v38  ;;  %v2469_v40 = vpop.eup %2468  ;;  %v1549_v38 = vld [vmem:[%s3227_s0 + $0x28] sm:$0xff] }
 0x108   :  { %v230_v43 = vadd.f32 1.0, %v2469_v40 }
 0x109   :  { %2470 = vrcp.f32 %v223_v39 }
 0x10a   :  { %2472 = vrcp.f32 %v230_v43 }
 0x113   :  { %v2471_v47 = vpop.eup %2470 }
 0x114   :  { %v240_v49 = vmul.f32 %v2471_v47, %v239_v45  ;;  %v2473_v51 = vpop.eup %2472 }
 0x115   :  { %v243_v52 = vsub.f32 1.0, %v2473_v51  ;;  %v245_v58 = vmul.f32 0.0, %v2473_v51  ;;  %v432_v51 = vpop.permute.xlu0 %431 }
 0x116   :  { %v241_v50 = vadd.f32 %v240_v49, %v77_v48 }
 0x118   :  { %2474 = vtanh.f32 %v241_v50 }
 0x122   :  { %v2475_v54 = vpop.eup %2474 }
 0x123   :  { %v244_v57 = vmul.f32 %v2475_v54, %v243_v52 }
 0x125   :  { %v246_v59 = vadd.f32 %v245_v58, %v244_v57 }
 0x127   :  { %v2868_v61 = vmul.f32 %v251_v60, %v246_v59  ;;  %v1554_v59 = vld [vmem:[%s3227_s0 + $0x30] sm:$0xff] }
 0x129   :  { %254 = vst [vmem:[%s3229_s4] sm:$0xff] %v2868_v61  ;;  %329 = vmatmul.mubr.f32.vlgmr.msra.gmra.mrb[2].mxu0 %v2868_v61  ;;  %1800 = vmatmul.mubr.f32.vlgmr.msra.gmra.mrb[2].mxu1 %v2868_v61 }
 0x12a   :  { %2127 = vmatpush1.bf16.msra.mxu0 %v2599_v10  ;;  %2158 = vmatpush3.bf16.msra.mxu1 %v2658_v30 }
 0x12b   :  { %2129 = vmatprep.subr.bf16.mxu0 %v2601_v11  ;;  %2159 = vmatprep.subr.bf16.mxu1 %v2546_v3 }
 0x12c   :  { %510 = vmatprep.mubr.f32.mxu0 %v2547_v4  ;;  %1834 = vmatprep.mubr.msk.f32.mxu1 %vm2548_vm0, %v2547_v4 }
 0x12e   :  { %2131 = vmatpush1.bf16.msra.mxu0 %v2617_v16  ;;  %2161 = vmatpush3.bf16.msra.mxu1 %v2673_v35 }
 0x12f   :  { %2133 = vmatprep.subr.bf16.mxu0 %v2620_v17  ;;  %2162 = vmatprep.subr.bf16.mxu1 %v2546_v3 }
 0x132   :  { %2135 = vmatpush1.bf16.msra.mxu0 %v2635_v22  ;;  %2164 = vmatpush3.bf16.msra.mxu1 %v2701_v44 }
 0x133   :  { %2137 = vmatprep.subr.bf16.mxu0 %v2641_v24  ;;  %2165 = vmatprep.subr.bf16.mxu1 %v2546_v3 }
 0x136   :  { %2139 = vmatpush1.bf16.msra.mxu0 %v2667_v33  ;;  %2167 = vmatpush3.bf16.msra.mxu1 %v2735_v55 }
 0x137   :  { %2141 = vmatprep.subr.bf16.mxu0 %v2676_v36  ;;  %2168 = vmatprep.subr.bf16.mxu1 %v2546_v3 }
 0x13a   :  { %2143 = vmatpush1.bf16.msra.mxu0 %v2695_v42  ;;  %2170 = vmatpush3.bf16.msra.mxu1 %v2766_v1 }
 0x13b   :  { %2145 = vmatprep.subr.bf16.mxu0 %v2707_v46  ;;  %2171 = vmatprep.subr.bf16.mxu1 %v2546_v3 }
 0x13e   :  { %2147 = vmatpush1.bf16.msra.mxu0 %v2729_v53  ;;  %2173 = vmatpush3.bf16.msra.mxu1 %v2788_v13 }
 0x13f   :  { %2149 = vmatprep.subr.bf16.mxu0 %v2738_v56  ;;  %2174 = vmatprep.subr.bf16.mxu1 %v2546_v3 }
 0x142   :  { %2151 = vmatpush1.bf16.msra.mxu0 %v2760_v63  ;;  %2176 = vmatpush3.bf16.msra.mxu1 %v2800_v18 }
 0x143   :  { %2153 = vmatprep.subr.bf16.mxu0 %v2769_v2  ;;  %2177 = vmatprep.subr.bf16.mxu1 %v2546_v3 }
 0x146   :  { %2155 = vmatpush1.bf16.msra.mxu0 %v2785_v12  ;;  %2179 = vmatpush3.bf16.msra.mxu1 %v2812_v21 }
 0x147   :  { %2181 = vmatprep.subr.bf16.mxu0 %v2586_v5  ;;  %2212 = vmatprep.subr.bf16.mxu1 %v2546_v3 }
 0x1fc   :  { %v330_v9 = vpop.f32.mrb[2].mxu0  ;;  %v401_v14 = vpop.f32.mrb[2].mxu1 }
 0x1fd   :  { %v405_v15 = vadd.f32 %v1547_v8, %v330_v9  ;;  %v332_v20 = vpop.f32.mrb[3].mxu0  ;;  %v1801_v23 = vpop.f32.mrb[3].mxu1  ;;  %v419_v34 = vadd.f32 %v2862_v41, %v401_v14 }
 0x1fe   :  { %v412_v26 = vadd.f32 %v1548_v19, %v332_v20 }
 0x1ff   :  { %v1550_v25 = vmul.f32 -1.442695, %v405_v15 }
 0x200   :  { %v1551_v27 = vmul.f32 -1.442695, %v412_v26 }
 0x201   :  { %2476 = vpow2.f32 %v1550_v25 }
 0x202   :  { %2478 = vpow2.f32 %v1551_v27  ;;  %v1556_v27 = vld [vmem:[%s3227_s0 + $0x40] sm:$0xff] }
 0x20b   :  { %v2477_v28 = vpop.eup %2476 }
 0x20c   :  { %v409_v29 = vadd.f32 1.0, %v2477_v28  ;;  %v2479_v31 = vpop.eup %2478 }
 0x20d   :  { %v416_v32 = vadd.f32 1.0, %v2479_v31 }
 0x20e   :  { %2480 = vrcp.f32 %v409_v29 }
 0x20f   :  { %2482 = vrcp.f32 %v416_v32 }
 0x218   :  { %v2481_v37 = vpop.eup %2480 }
 0x219   :  { %v420_v39 = vmul.f32 %v2481_v37, %v419_v34  ;;  %v2483_v43 = vpop.eup %2482 }
 0x21a   :  { %v423_v45 = vsub.f32 1.0, %v2483_v43  ;;  %v425_v49 = vmul.f32 %v2483_v43, %v2868_v61 }
 0x21b   :  { %v421_v40 = vadd.f32 %v1549_v38, %v420_v39 }
 0x21d   :  { %2484 = vtanh.f32 %v421_v40  ;;  %v614_v40 = vpop.permute.xlu1 %613 }
 0x227   :  { %v2485_v47 = vpop.eup %2484 }
 0x228   :  { %v424_v48 = vmul.f32 %v2485_v47, %v423_v45 }
 0x22a   :  { %v426_v50 = vadd.f32 %v425_v49, %v424_v48  ;;  %v1561_v49 = vld [vmem:[%s3227_s0 + $0x48] sm:$0xff] }
 0x22c   :  { %v434_v52 = vmul.f32 %v432_v51, %v426_v50  ;;  %v437_v54 = vsub.f32 %v426_v50, %v2868_v61 }
 0x22e   :  { %1553 = vst [vmem:[%s3229_s4 + $0x8] sm:$0xff] %v434_v52  ;;  %v438_v57 = vmul.f32 %v437_v54, %v432_v51  ;;  %v1562_v54 = vld [vmem:[%s3227_s0 + $0x50] sm:$0xff] }
 0x230   :  { %v2939_v58 = vadd.f32 %v438_v57, %v2868_v61 }
 0x232   :  { %511 = vmatmul.mubr.f32.vlgmr.msra.gmra.mrb[4].mxu0 %v2939_v58  ;;  %1835 = vmatmul.mubr.f32.vlgmr.msra.gmra.mrb[4].mxu1 %v2939_v58 }
 0x233   :  { %2183 = vmatpush1.bf16.msra.mxu0 %v2599_v10  ;;  %2214 = vmatpush3.bf16.msra.mxu1 %v2658_v30 }
 0x234   :  { %2185 = vmatprep.subr.bf16.mxu0 %v2601_v11  ;;  %2215 = vmatprep.subr.bf16.mxu1 %v2546_v3 }
 0x235   :  { %692 = vmatprep.mubr.f32.mxu0 %v2547_v4  ;;  %1869 = vmatprep.mubr.msk.f32.mxu1 %vm2548_vm0, %v2547_v4 }
 0x237   :  { %2187 = vmatpush1.bf16.msra.mxu0 %v2617_v16  ;;  %2217 = vmatpush3.bf16.msra.mxu1 %v2673_v35 }
 0x238   :  { %2189 = vmatprep.subr.bf16.mxu0 %v2620_v17  ;;  %2218 = vmatprep.subr.bf16.mxu1 %v2546_v3 }
 0x23b   :  { %2191 = vmatpush1.bf16.msra.mxu0 %v2635_v22  ;;  %2220 = vmatpush3.bf16.msra.mxu1 %v2701_v44 }
 0x23c   :  { %2193 = vmatprep.subr.bf16.mxu0 %v2641_v24  ;;  %2221 = vmatprep.subr.bf16.mxu1 %v2546_v3 }
 0x23f   :  { %2195 = vmatpush1.bf16.msra.mxu0 %v2667_v33  ;;  %2223 = vmatpush3.bf16.msra.mxu1 %v2735_v55 }
 0x240   :  { %2197 = vmatprep.subr.bf16.mxu0 %v2676_v36  ;;  %2224 = vmatprep.subr.bf16.mxu1 %v2546_v3 }
 0x243   :  { %2199 = vmatpush1.bf16.msra.mxu0 %v2695_v42  ;;  %2226 = vmatpush3.bf16.msra.mxu1 %v2766_v1 }
 0x244   :  { %2201 = vmatprep.subr.bf16.mxu0 %v2707_v46  ;;  %2227 = vmatprep.subr.bf16.mxu1 %v2546_v3 }
 0x247   :  { %2203 = vmatpush1.bf16.msra.mxu0 %v2729_v53  ;;  %2229 = vmatpush3.bf16.msra.mxu1 %v2788_v13 }
 0x248   :  { %2205 = vmatprep.subr.bf16.mxu0 %v2738_v56  ;;  %2230 = vmatprep.subr.bf16.mxu1 %v2546_v3 }
 0x24b   :  { %2207 = vmatpush1.bf16.msra.mxu0 %v2760_v63  ;;  %2232 = vmatpush3.bf16.msra.mxu1 %v2800_v18 }
 0x24c   :  { %2209 = vmatprep.subr.bf16.mxu0 %v2769_v2  ;;  %2233 = vmatprep.subr.bf16.mxu1 %v2546_v3 }
 0x24f   :  { %2211 = vmatpush1.bf16.msra.mxu0 %v2785_v12  ;;  %2235 = vmatpush3.bf16.msra.mxu1 %v2812_v21 }
 0x250   :  { %2237 = vmatprep.subr.bf16.mxu0 %v2586_v5  ;;  %2268 = vmatprep.subr.bf16.mxu1 %v2546_v3 }
 0x305   :  { %v512_v60 = vpop.f32.mrb[4].mxu0  ;;  %v583_v61 = vpop.f32.mrb[4].mxu1 }
 0x306   :  { %v587_v62 = vadd.f32 %v1554_v59, %v512_v60  ;;  %v514_v6 = vpop.f32.mrb[5].mxu0  ;;  %v1836_v7 = vpop.f32.mrb[5].mxu1  ;;  %v601_v25 = vadd.f32 %v2862_v41, %v583_v61 }
 0x307   :  { %v594_v9 = vadd.f32 %v1555_v0, %v514_v6 }
 0x308   :  { %v1557_v8 = vmul.f32 -1.442695, %v587_v62 }
 0x309   :  { %v1558_v14 = vmul.f32 -1.442695, %v594_v9 }
 0x30a   :  { %2486 = vpow2.f32 %v1557_v8 }
 0x30b   :  { %2488 = vpow2.f32 %v1558_v14  ;;  %v1563_v14 = vld [vmem:[%s3227_s0 + $0x58] sm:$0xff] }
 0x314   :  { %v2487_v15 = vpop.eup %2486 }
 0x315   :  { %v591_v19 = vadd.f32 1.0, %v2487_v15  ;;  %v2489_v20 = vpop.eup %2488 }
 0x316   :  { %v598_v23 = vadd.f32 1.0, %v2489_v20 }
 0x317   :  { %2490 = vrcp.f32 %v591_v19 }
 0x318   :  { %2492 = vrcp.f32 %v598_v23 }
 0x321   :  { %v2491_v26 = vpop.eup %2490 }
 0x322   :  { %v602_v28 = vmul.f32 %v2491_v26, %v601_v25  ;;  %v2493_v31 = vpop.eup %2492 }
 0x323   :  { %v605_v32 = vsub.f32 1.0, %v2493_v31  ;;  %v607_v38 = vmul.f32 %v2493_v31, %v2939_v58 }
 0x324   :  { %v603_v29 = vadd.f32 %v1556_v27, %v602_v28 }
 0x326   :  { %2494 = vtanh.f32 %v603_v29  ;;  %v796_v29 = vpop.permute.xlu1 %795 }
 0x330   :  { %v2495_v34 = vpop.eup %2494 }
 0x331   :  { %v606_v37 = vmul.f32 %v2495_v34, %v605_v32 }
 0x333   :  { %v608_v39 = vadd.f32 %v607_v38, %v606_v37  ;;  %v1568_v38 = vld [vmem:[%s3227_s0 + $0x60] sm:$0xff] }
 0x335   :  { %v616_v43 = vmul.f32 %v614_v40, %v608_v39  ;;  %v619_v45 = vsub.f32 %v608_v39, %v2939_v58 }
 0x337   :  { %1560 = vst [vmem:[%s3229_s4 + $0x10] sm:$0xff] %v616_v43  ;;  %v620_v47 = vmul.f32 %v619_v45, %v614_v40  ;;  %v1569_v45 = vld [vmem:[%s3227_s0 + $0x68] sm:$0xff] }
 0x339   :  { %v2994_v48 = vadd.f32 %v620_v47, %v2939_v58 }
 0x33b   :  { %693 = vmatmul.mubr.f32.vlgmr.msra.gmra.mrb[6].mxu0 %v2994_v48  ;;  %1870 = vmatmul.mubr.f32.vlgmr.msra.gmra.mrb[6].mxu1 %v2994_v48 }
 0x33c   :  { %2239 = vmatpush1.bf16.msra.mxu0 %v2599_v10  ;;  %2270 = vmatpush3.bf16.msra.mxu1 %v2658_v30 }
 0x33d   :  { %2241 = vmatprep.subr.bf16.mxu0 %v2601_v11  ;;  %2271 = vmatprep.subr.bf16.mxu1 %v2546_v3 }
 0x33e   :  { %874 = vmatprep.mubr.f32.mxu0 %v2547_v4  ;;  %1904 = vmatprep.mubr.msk.f32.mxu1 %vm2548_vm0, %v2547_v4 }
 0x340   :  { %2243 = vmatpush1.bf16.msra.mxu0 %v2617_v16  ;;  %2273 = vmatpush3.bf16.msra.mxu1 %v2673_v35 }
 0x341   :  { %2245 = vmatprep.subr.bf16.mxu0 %v2620_v17  ;;  %2274 = vmatprep.subr.bf16.mxu1 %v2546_v3 }
 0x344   :  { %2247 = vmatpush1.bf16.msra.mxu0 %v2635_v22  ;;  %2276 = vmatpush3.bf16.msra.mxu1 %v2701_v44 }
 0x345   :  { %2249 = vmatprep.subr.bf16.mxu0 %v2641_v24  ;;  %2277 = vmatprep.subr.bf16.mxu1 %v2546_v3 }
 0x348   :  { %2251 = vmatpush1.bf16.msra.mxu0 %v2667_v33  ;;  %2279 = vmatpush3.bf16.msra.mxu1 %v2735_v55 }
 0x349   :  { %2253 = vmatprep.subr.bf16.mxu0 %v2676_v36  ;;  %2280 = vmatprep.subr.bf16.mxu1 %v2546_v3 }
 0x34c   :  { %2255 = vmatpush1.bf16.msra.mxu0 %v2695_v42  ;;  %2282 = vmatpush3.bf16.msra.mxu1 %v2766_v1 }
 0x34d   :  { %2257 = vmatprep.subr.bf16.mxu0 %v2707_v46  ;;  %2283 = vmatprep.subr.bf16.mxu1 %v2546_v3 }
 0x350   :  { %2259 = vmatpush1.bf16.msra.mxu0 %v2729_v53  ;;  %2285 = vmatpush3.bf16.msra.mxu1 %v2788_v13 }
 0x351   :  { %2261 = vmatprep.subr.bf16.mxu0 %v2738_v56  ;;  %2286 = vmatprep.subr.bf16.mxu1 %v2546_v3 }
 0x354   :  { %2263 = vmatpush1.bf16.msra.mxu0 %v2760_v63  ;;  %2288 = vmatpush3.bf16.msra.mxu1 %v2800_v18 }
 0x355   :  { %2265 = vmatprep.subr.bf16.mxu0 %v2769_v2  ;;  %2289 = vmatprep.subr.bf16.mxu1 %v2546_v3 }
 0x358   :  { %2267 = vmatpush1.bf16.msra.mxu0 %v2785_v12  ;;  %2291 = vmatpush3.bf16.msra.mxu1 %v2812_v21 }
 0x359   :  { %2293 = vmatprep.subr.bf16.mxu0 %v2586_v5  ;;  %2324 = vmatprep.subr.bf16.mxu1 %v2546_v3 }
 0x40e   :  { %v694_v50 = vpop.f32.mrb[6].mxu0  ;;  %v765_v51 = vpop.f32.mrb[6].mxu1 }
 0x40f   :  { %v769_v52 = vadd.f32 %v1561_v49, %v694_v50  ;;  %v696_v57 = vpop.f32.mrb[7].mxu0  ;;  %v1871_v58 = vpop.f32.mrb[7].mxu1  ;;  %v783_v8 = vadd.f32 %v2862_v41, %v765_v51 }
 0x410   :  { %v776_v60 = vadd.f32 %v1562_v54, %v696_v57 }
 0x411   :  { %v1564_v59 = vmul.f32 -1.442695, %v769_v52 }
 0x412   :  { %v1565_v61 = vmul.f32 -1.442695, %v776_v60 }
 0x413   :  { %2496 = vpow2.f32 %v1564_v59 }
 0x414   :  { %2498 = vpow2.f32 %v1565_v61  ;;  %v1570_v61 = vld [vmem:[%s3227_s0 + $0x70] sm:$0xff] }
 0x41d   :  { %v2497_v62 = vpop.eup %2496 }
 0x41e   :  { %v773_v0 = vadd.f32 1.0, %v2497_v62  ;;  %v2499_v6 = vpop.eup %2498 }
 0x41f   :  { %v780_v7 = vadd.f32 1.0, %v2499_v6 }
 0x420   :  { %2500 = vrcp.f32 %v773_v0 }
 0x421   :  { %2502 = vrcp.f32 %v780_v7 }
 0x42a   :  { %v2501_v9 = vpop.eup %2500 }
 0x42b   :  { %v784_v15 = vmul.f32 %v2501_v9, %v783_v8  ;;  %v2503_v20 = vpop.eup %2502 }
 0x42c   :  { %v787_v23 = vsub.f32 1.0, %v2503_v20  ;;  %v789_v27 = vmul.f32 %v2503_v20, %v2994_v48 }
 0x42d   :  { %v785_v19 = vadd.f32 %v1563_v14, %v784_v15 }
 0x42f   :  { %2504 = vtanh.f32 %v785_v19  ;;  %v978_v19 = vpop.permute.xlu0 %977 }
 0x439   :  { %v2505_v25 = vpop.eup %2504 }
 0x43a   :  { %v788_v26 = vmul.f32 %v2505_v25, %v787_v23 }
 0x43c   :  { %v790_v28 = vadd.f32 %v789_v27, %v788_v26  ;;  %v1575_v27 = vld [vmem:[%s3227_s0 + $0x78] sm:$0xff] }
 0x43e   :  { %v798_v31 = vmul.f32 %v796_v29, %v790_v28  ;;  %v801_v32 = vsub.f32 %v790_v28, %v2994_v48 }
 0x440   :  { %1567 = vst [vmem:[%s3229_s4 + $0x18] sm:$0xff] %v798_v31  ;;  %v802_v34 = vmul.f32 %v801_v32, %v796_v29  ;;  %v1576_v32 = vld [vmem:[%s3227_s0 + $0x80] sm:$0xff] }
 0x442   :  { %v3049_v37 = vadd.f32 %v802_v34, %v2994_v48 }
 0x444   :  { %875 = vmatmul.mubr.f32.vlgmr.msra.gmra.mrb[8].mxu0 %v3049_v37  ;;  %1905 = vmatmul.mubr.f32.vlgmr.msra.gmra.mrb[8].mxu1 %v3049_v37 }
 0x445   :  { %2295 = vmatpush1.bf16.msra.mxu0 %v2599_v10  ;;  %2326 = vmatpush3.bf16.msra.mxu1 %v2658_v30 }
 0x446   :  { %2297 = vmatprep.subr.bf16.mxu0 %v2601_v11  ;;  %2327 = vmatprep.subr.bf16.mxu1 %v2546_v3 }
 0x447   :  { %1056 = vmatprep.mubr.f32.mxu0 %v2547_v4  ;;  %1939 = vmatprep.mubr.msk.f32.mxu1 %vm2548_vm0, %v2547_v4 }
 0x449   :  { %2299 = vmatpush1.bf16.msra.mxu0 %v2617_v16  ;;  %2329 = vmatpush3.bf16.msra.mxu1 %v2673_v35 }
 0x44a   :  { %2301 = vmatprep.subr.bf16.mxu0 %v2620_v17  ;;  %2330 = vmatprep.subr.bf16.mxu1 %v2546_v3 }
 0x44d   :  { %2303 = vmatpush1.bf16.msra.mxu0 %v2635_v22  ;;  %2332 = vmatpush3.bf16.msra.mxu1 %v2701_v44 }
 0x44e   :  { %2305 = vmatprep.subr.bf16.mxu0 %v2641_v24  ;;  %2333 = vmatprep.subr.bf16.mxu1 %v2546_v3 }
 0x451   :  { %2307 = vmatpush1.bf16.msra.mxu0 %v2667_v33  ;;  %2335 = vmatpush3.bf16.msra.mxu1 %v2735_v55 }
 0x452   :  { %2309 = vmatprep.subr.bf16.mxu0 %v2676_v36  ;;  %2336 = vmatprep.subr.bf16.mxu1 %v2546_v3 }
 0x455   :  { %2311 = vmatpush1.bf16.msra.mxu0 %v2695_v42  ;;  %2338 = vmatpush3.bf16.msra.mxu1 %v2766_v1 }
 0x456   :  { %2313 = vmatprep.subr.bf16.mxu0 %v2707_v46  ;;  %2339 = vmatprep.subr.bf16.mxu1 %v2546_v3 }
 0x459   :  { %2315 = vmatpush1.bf16.msra.mxu0 %v2729_v53  ;;  %2341 = vmatpush3.bf16.msra.mxu1 %v2788_v13 }
 0x45a   :  { %2317 = vmatprep.subr.bf16.mxu0 %v2738_v56  ;;  %2342 = vmatprep.subr.bf16.mxu1 %v2546_v3 }
 0x45d   :  { %2319 = vmatpush1.bf16.msra.mxu0 %v2760_v63  ;;  %2344 = vmatpush3.bf16.msra.mxu1 %v2800_v18 }
 0x45e   :  { %2321 = vmatprep.subr.bf16.mxu0 %v2769_v2  ;;  %2345 = vmatprep.subr.bf16.mxu1 %v2546_v3 }
 0x461   :  { %2323 = vmatpush1.bf16.msra.mxu0 %v2785_v12  ;;  %2347 = vmatpush3.bf16.msra.mxu1 %v2812_v21 }
 0x462   :  { %2349 = vmatprep.subr.bf16.mxu0 %v2586_v5  ;;  %2380 = vmatprep.subr.bf16.mxu1 %v2546_v3 }
 0x517   :  { %v876_v39 = vpop.f32.mrb[8].mxu0  ;;  %v947_v40 = vpop.f32.mrb[8].mxu1 }
 0x518   :  { %v951_v43 = vadd.f32 %v1568_v38, %v876_v39  ;;  %v878_v47 = vpop.f32.mrb[9].mxu0  ;;  %v1906_v48 = vpop.f32.mrb[9].mxu1  ;;  %v965_v59 = vadd.f32 %v2862_v41, %v947_v40 }
 0x519   :  { %v958_v50 = vadd.f32 %v1569_v45, %v878_v47 }
 0x51a   :  { %v1571_v49 = vmul.f32 -1.442695, %v951_v43 }
 0x51b   :  { %v1572_v51 = vmul.f32 -1.442695, %v958_v50  ;;  %v1577_v50 = vld [vmem:[%s3227_s0 + $0x88] sm:$0xff] }
 0x51c   :  { %2506 = vpow2.f32 %v1571_v49 }
 0x51d   :  { %2508 = vpow2.f32 %v1572_v51 }
 0x526   :  { %v2507_v52 = vpop.eup %2506 }
 0x527   :  { %v955_v54 = vadd.f32 1.0, %v2507_v52  ;;  %v2509_v57 = vpop.eup %2508 }
 0x528   :  { %v962_v58 = vadd.f32 1.0, %v2509_v57 }
 0x529   :  { %2510 = vrcp.f32 %v955_v54 }
 0x52a   :  { %2512 = vrcp.f32 %v962_v58 }
 0x533   :  { %v2511_v60 = vpop.eup %2510 }
 0x534   :  { %v966_v62 = vmul.f32 %v2511_v60, %v965_v59  ;;  %v2513_v6 = vpop.eup %2512 }
 0x535   :  { %v969_v7 = vsub.f32 1.0, %v2513_v6  ;;  %v971_v14 = vmul.f32 %v2513_v6, %v3049_v37 }
 0x536   :  { %v967_v0 = vadd.f32 %v1570_v61, %v966_v62  ;;  %v1160_v62 = vpop.permute.xlu1 %1159 }
 0x538   :  { %2514 = vtanh.f32 %v967_v0 }
 0x542   :  { %v2515_v8 = vpop.eup %2514 }
 0x543   :  { %v970_v9 = vmul.f32 %v2515_v8, %v969_v7 }
 0x545   :  { %v972_v15 = vadd.f32 %v971_v14, %v970_v9  ;;  %v1342_v9 = vpop.permute.xlu0 %1341 }
 0x547   :  { %v980_v20 = vmul.f32 %v978_v19, %v972_v15  ;;  %v983_v23 = vsub.f32 %v972_v15, %v3049_v37 }
 0x549   :  { %1574 = vst [vmem:[%s3229_s4 + $0x20] sm:$0xff] %v980_v20  ;;  %v984_v25 = vmul.f32 %v983_v23, %v978_v19  ;;  %v1589_v23 = vld [vmem:[%s3227_s0 + $0xa8] sm:$0xff] }
 0x54b   :  { %v3104_v26 = vadd.f32 %v984_v25, %v3049_v37 }
 0x54d   :  { %1057 = vmatmul.mubr.f32.vlgmr.msra.gmra.mrb[10].mxu0 %v3104_v26  ;;  %1940 = vmatmul.mubr.f32.vlgmr.msra.gmra.mrb[10].mxu1 %v3104_v26 }
 0x54e   :  { %2351 = vmatpush1.bf16.msra.mxu0 %v2599_v10  ;;  %2382 = vmatpush3.bf16.msra.mxu1 %v2658_v30 }
 0x54f   :  { %2353 = vmatprep.subr.bf16.mxu0 %v2601_v11  ;;  %2383 = vmatprep.subr.bf16.mxu1 %v2546_v3 }
 0x550   :  { %1238 = vmatprep.mubr.f32.mxu0 %v2547_v4  ;;  %1974 = vmatprep.mubr.msk.f32.mxu1 %vm2548_vm0, %v2547_v4 }
 0x552   :  { %2355 = vmatpush1.bf16.msra.mxu0 %v2617_v16  ;;  %2385 = vmatpush3.bf16.msra.mxu1 %v2673_v35 }
 0x553   :  { %2357 = vmatprep.subr.bf16.mxu0 %v2620_v17  ;;  %2386 = vmatprep.subr.bf16.mxu1 %v2546_v3 }
 0x556   :  { %2359 = vmatpush1.bf16.msra.mxu0 %v2635_v22  ;;  %2388 = vmatpush3.bf16.msra.mxu1 %v2701_v44 }
 0x557   :  { %2361 = vmatprep.subr.bf16.mxu0 %v2641_v24  ;;  %2389 = vmatprep.subr.bf16.mxu1 %v2546_v3 }
 0x55a   :  { %2363 = vmatpush1.bf16.msra.mxu0 %v2667_v33  ;;  %2391 = vmatpush3.bf16.msra.mxu1 %v2735_v55 }
 0x55b   :  { %2365 = vmatprep.subr.bf16.mxu0 %v2676_v36  ;;  %2392 = vmatprep.subr.bf16.mxu1 %v2546_v3 }
 0x55e   :  { %2367 = vmatpush1.bf16.msra.mxu0 %v2695_v42  ;;  %2394 = vmatpush3.bf16.msra.mxu1 %v2766_v1 }
 0x55f   :  { %2369 = vmatprep.subr.bf16.mxu0 %v2707_v46  ;;  %2395 = vmatprep.subr.bf16.mxu1 %v2546_v3 }
 0x562   :  { %2371 = vmatpush1.bf16.msra.mxu0 %v2729_v53  ;;  %2397 = vmatpush3.bf16.msra.mxu1 %v2788_v13 }
 0x563   :  { %2373 = vmatprep.subr.bf16.mxu0 %v2738_v56  ;;  %2398 = vmatprep.subr.bf16.mxu1 %v2546_v3 }
 0x566   :  { %2375 = vmatpush1.bf16.msra.mxu0 %v2760_v63  ;;  %2400 = vmatpush3.bf16.msra.mxu1 %v2800_v18 }
 0x567   :  { %2377 = vmatprep.subr.bf16.mxu0 %v2769_v2  ;;  %2401 = vmatprep.subr.bf16.mxu1 %v2546_v3 }
 0x56a   :  { %2379 = vmatpush1.bf16.msra.mxu0 %v2785_v12  ;;  %2403 = vmatpush3.bf16.msra.mxu1 %v2812_v21 }
 0x56b   :  { %2405 = vmatprep.subr.bf16.mxu0 %v2586_v5  ;;  %2436 = vmatprep.subr.bf16.mxu1 %v2546_v3 }
 0x620   :  { %v1058_v28 = vpop.f32.mrb[10].mxu0  ;;  %v1129_v29 = vpop.f32.mrb[10].mxu1 }
 0x621   :  { %v1133_v31 = vadd.f32 %v1575_v27, %v1058_v28  ;;  %v1060_v34 = vpop.f32.mrb[11].mxu0  ;;  %v1941_v37 = vpop.f32.mrb[11].mxu1  ;;  %v1147_v48 = vadd.f32 %v2862_v41, %v1129_v29  ;;  %v1590_v28 = vld [vmem:[%s3227_s0 + $0xb0] sm:$0xff] }
 0x622   :  { %v1140_v39 = vadd.f32 %v1576_v32, %v1060_v34 }
 0x623   :  { %v1578_v38 = vmul.f32 -1.442695, %v1133_v31 }
 0x624   :  { %v1579_v40 = vmul.f32 -1.442695, %v1140_v39 }
 0x625   :  { %2516 = vpow2.f32 %v1578_v38 }
 0x626   :  { %2518 = vpow2.f32 %v1579_v40 }
 0x62f   :  { %v2517_v5 = vpop.eup %2516 }
 0x630   :  { %v1137_v43 = vadd.f32 1.0, %v2517_v5  ;;  %v2519_v45 = vpop.eup %2518 }
 0x631   :  { %v1144_v47 = vadd.f32 1.0, %v2519_v45 }
 0x632   :  { %2520 = vrcp.f32 %v1137_v43 }
 0x633   :  { %2522 = vrcp.f32 %v1144_v47  ;;  %v1591_v47 = vld [vmem:[%s3227_s0 + $0xb8] sm:$0xff] }
 0x63c   :  { %v2521_v49 = vpop.eup %2520 }
 0x63d   :  { %v1148_v51 = vmul.f32 %v2521_v49, %v1147_v48  ;;  %v2523_v54 = vpop.eup %2522 }
 0x63e   :  { %v1151_v57 = vsub.f32 1.0, %v2523_v54  ;;  %v1153_v60 = vmul.f32 %v2523_v54, %v3104_v26 }
 0x63f   :  { %v1149_v52 = vadd.f32 %v1577_v50, %v1148_v51 }
 0x641   :  { %2524 = vtanh.f32 %v1149_v52 }
 0x64b   :  { %v2525_v58 = vpop.eup %2524 }
 0x64c   :  { %v1152_v59 = vmul.f32 %v2525_v58, %v1151_v57 }
 0x64e   :  { %v1154_v61 = vadd.f32 %v1153_v60, %v1152_v59  ;;  %v1524_v59 = vpop.permute.xlu1 %1523 }
 0x650   :  { %v1162_v0 = vmul.f32 %v1160_v62, %v1154_v61  ;;  %v1165_v6 = vsub.f32 %v1154_v61, %v3104_v26 }
 0x652   :  { %1581 = vst [vmem:[%s3229_s4 + $0x28] sm:$0xff] %v1162_v0  ;;  %v1166_v7 = vmul.f32 %v1165_v6, %v1160_v62 }
 0x654   :  { %v3159_v8 = vadd.f32 %v1166_v7, %v3104_v26 }
 0x656   :  { %1239 = vmatmul.mubr.f32.vlgmr.msra.gmra.mrb[12].mxu0 %v3159_v8  ;;  %1975 = vmatmul.mubr.f32.vlgmr.msra.gmra.mrb[12].mxu1 %v3159_v8 }
 0x657   :  { %2407 = vmatpush1.bf16.msra.mxu0 %v2599_v10  ;;  %2438 = vmatpush3.bf16.msra.mxu1 %v2658_v30 }
 0x658   :  { %2409 = vmatprep.subr.bf16.mxu0 %v2601_v11  ;;  %2439 = vmatprep.subr.bf16.mxu1 %v2546_v3 }
 0x659   :  { %1420 = vmatprep.mubr.f32.mxu0 %v2547_v4  ;;  %2009 = vmatprep.mubr.msk.f32.mxu1 %vm2548_vm0, %v2547_v4  ;;  %v1582_v4 = vld [vmem:[%s3227_s0 + $0x90] sm:$0xff] }
 0x65b   :  { %2411 = vmatpush1.bf16.msra.mxu0 %v2617_v16  ;;  %2441 = vmatpush3.bf16.msra.mxu1 %v2673_v35 }
 0x65c   :  { %2413 = vmatprep.subr.bf16.mxu0 %v2620_v17  ;;  %2442 = vmatprep.subr.bf16.mxu1 %v2546_v3  ;;  %v1583_v17 = vld [vmem:[%s3227_s0 + $0x98] sm:$0xff] }
 0x65f   :  { %2415 = vmatpush1.bf16.msra.mxu0 %v2635_v22  ;;  %2444 = vmatpush3.bf16.msra.mxu1 %v2701_v44 }
 0x660   :  { %2417 = vmatprep.subr.bf16.mxu0 %v2641_v24  ;;  %2445 = vmatprep.subr.bf16.mxu1 %v2546_v3 }
 0x663   :  { %2419 = vmatpush1.bf16.msra.mxu0 %v2667_v33  ;;  %2447 = vmatpush3.bf16.msra.mxu1 %v2735_v55  ;;  %v1584_v55 = vld [vmem:[%s3227_s0 + $0xa0] sm:$0xff] }
 0x664   :  { %2421 = vmatprep.subr.bf16.mxu0 %v2676_v36  ;;  %2448 = vmatprep.subr.bf16.mxu1 %v2546_v3 }
 0x667   :  { %2423 = vmatpush1.bf16.msra.mxu0 %v2695_v42  ;;  %2450 = vmatpush3.bf16.msra.mxu1 %v2766_v1 }
 0x668   :  { %2425 = vmatprep.subr.bf16.mxu0 %v2707_v46  ;;  %2451 = vmatprep.subr.bf16.mxu1 %v2546_v3 }
 0x66b   :  { %2427 = vmatpush1.bf16.msra.mxu0 %v2729_v53  ;;  %2453 = vmatpush3.bf16.msra.mxu1 %v2788_v13 }
 0x66c   :  { %2429 = vmatprep.subr.bf16.mxu0 %v2738_v56  ;;  %2454 = vmatprep.subr.bf16.mxu1 %v2546_v3 }
 0x66f   :  { %2431 = vmatpush1.bf16.msra.mxu0 %v2760_v63  ;;  %2456 = vmatpush3.bf16.msra.mxu1 %v2800_v18 }
 0x670   :  { %2433 = vmatprep.subr.bf16.mxu0 %v2769_v2  ;;  %2457 = vmatprep.subr.bf16.mxu1 %v2546_v3 }
 0x673   :  { %2435 = vmatpush1.bf16.msra.mxu0 %v2785_v12  ;;  %2459 = vmatpush3.bf16.msra.mxu1 %v2812_v21 }
 0x729   :  { %v1240_v10 = vpop.f32.mrb[12].mxu0  ;;  %v1311_v11 = vpop.f32.mrb[12].mxu1 }
 0x72a   :  { %v1315_v16 = vadd.f32 %v1582_v4, %v1240_v10  ;;  %v1242_v22 = vpop.f32.mrb[13].mxu0  ;;  %v1976_v24 = vpop.f32.mrb[13].mxu1  ;;  %v1329_v46 = vadd.f32 %v2862_v41, %v1311_v11 }
 0x72b   :  { %v1322_v33 = vadd.f32 %v1583_v17, %v1242_v22 }
 0x72c   :  { %v1585_v30 = vmul.f32 -1.442695, %v1315_v16 }
 0x72d   :  { %v1586_v3 = vmul.f32 -1.442695, %v1322_v33 }
 0x72e   :  { %2526 = vpow2.f32 %v1585_v30 }
 0x72f   :  { %2528 = vpow2.f32 %v1586_v3 }
 0x738   :  { %v2527_v35 = vpop.eup %2526 }
 0x739   :  { %v1319_v36 = vadd.f32 1.0, %v2527_v35  ;;  %v2529_v42 = vpop.eup %2528 }
 0x73a   :  { %v1326_v44 = vadd.f32 1.0, %v2529_v42 }
 0x73b   :  { %2530 = vrcp.f32 %v1319_v36 }
 0x73c   :  { %2532 = vrcp.f32 %v1326_v44 }
 0x745   :  { %v2531_v53 = vpop.eup %2530 }
 0x746   :  { %v1330_v56 = vmul.f32 %v2531_v53, %v1329_v46  ;;  %v2533_v1 = vpop.eup %2532 }
 0x747   :  { %v1333_v2 = vsub.f32 1.0, %v2533_v1  ;;  %v1335_v18 = vmul.f32 %v2533_v1, %v3159_v8 }
 0x748   :  { %v1331_v63 = vadd.f32 %v1584_v55, %v1330_v56 }
 0x74a   :  { %2534 = vtanh.f32 %v1331_v63 }
 0x754   :  { %v2535_v12 = vpop.eup %2534 }
 0x755   :  { %v1334_v13 = vmul.f32 %v2535_v12, %v1333_v2 }
 0x757   :  { %v1336_v21 = vadd.f32 %v1335_v18, %v1334_v13 }
 0x759   :  { %v1344_v14 = vmul.f32 %v1342_v9, %v1336_v21  ;;  %v1347_v15 = vsub.f32 %v1336_v21, %v3159_v8 }
 0x75b   :  { %1588 = vst [vmem:[%s3229_s4 + $0x30] sm:$0xff] %v1344_v14  ;;  %v1348_v19 = vmul.f32 %v1347_v15, %v1342_v9 }
 0x75d   :  { %v1349_v20 = vadd.f32 %v1348_v19, %v3159_v8 }
 0x75f   :  { %1421 = vmatmul.mubr.f32.vlgmr.msra.gmra.mrb[14].mxu0 %v1349_v20  ;;  %2010 = vmatmul.mubr.f32.vlgmr.msra.gmra.mrb[14].mxu1 %v1349_v20 }
 0x832   :  { %v1422_v25 = vpop.f32.mrb[14].mxu0  ;;  %v1493_v26 = vpop.f32.mrb[14].mxu1 }
 0x833   :  { %v1497_v27 = vadd.f32 %v1589_v23, %v1422_v25  ;;  %v1424_v29 = vpop.f32.mrb[15].mxu0  ;;  %v2011_v31 = vpop.f32.mrb[15].mxu1  ;;  %v1511_v43 = vadd.f32 %v2862_v41, %v1493_v26 }
 0x834   :  { %v1504_v34 = vadd.f32 %v1590_v28, %v1424_v29 }
 0x835   :  { %v1592_v32 = vmul.f32 -1.442695, %v1497_v27 }
 0x836   :  { %v1593_v37 = vmul.f32 -1.442695, %v1504_v34 }
 0x837   :  { %2536 = vpow2.f32 %v1592_v32 }
 0x838   :  { %2538 = vpow2.f32 %v1593_v37 }
 0x841   :  { %v2537_v38 = vpop.eup %2536 }
 0x842   :  { %v1501_v39 = vadd.f32 1.0, %v2537_v38  ;;  %v2539_v40 = vpop.eup %2538 }
 0x843   :  { %v1508_v5 = vadd.f32 1.0, %v2539_v40 }
 0x844   :  { %2540 = vrcp.f32 %v1501_v39 }
 0x845   :  { %2542 = vrcp.f32 %v1508_v5 }
 0x84e   :  { %v2541_v45 = vpop.eup %2540 }
 0x84f   :  { %v1512_v48 = vmul.f32 %v2541_v45, %v1511_v43  ;;  %v2543_v50 = vpop.eup %2542 }
 0x850   :  { %v1515_v51 = vsub.f32 1.0, %v2543_v50  ;;  %v1517_v57 = vmul.f32 %v2543_v50, %v1349_v20 }
 0x851   :  { %v1513_v49 = vadd.f32 %v1591_v47, %v1512_v48 }
 0x853   :  { %2544 = vtanh.f32 %v1513_v49 }
 0x85d   :  { %v2545_v52 = vpop.eup %2544 }
 0x85e   :  { %v1516_v54 = vmul.f32 %v2545_v52, %v1515_v51 }
 0x860   :  { %v1518_v58 = vadd.f32 %v1517_v57, %v1516_v54 }
 0x862   :  { %v1526_v60 = vmul.f32 %v1524_v59, %v1518_v58 }
 0x864   :  { %1595 = vst [vmem:[%s3229_s4 + $0x38] sm:$0xff] %v1526_v60 }

</bundles_post_ra>
